<compile_context>
chip_gen: v7x
topology: tpu7x:2x2x1
jax: 0.10.0
libtpu: 0.0.40
codegen_flags: <defaults>
</compile_context>

<pallas_src>
import functools

import jax
import jax.numpy as jnp
from jax.experimental import pallas as pl
from jax.experimental.pallas import tpu as pltpu

HIDDEN = 2048          # hard-coded in CAS_Module
BN_EPS = 1e-5
LANE = 128


def cas_kernel(x_ref, w_ref, b_ref, wcls_ref, feat_ref, cas_ref, sm_ref, *, nc):
    """Fused CAS tile:
       (TT, 3C)bf16 @ (3C, 2048)bf16 conv-as-matmul (BN + bias folded) + ReLU,
       classifier matmul padded to 128 lanes, L2 magnitude packed into spare
       lane column `nc`, masked class softmax (padded lanes excluded)."""
    x = x_ref[0]                                                  # (TT, 3C) bf16

    # conv3 + BN (folded) + ReLU
    y = jnp.dot(x, w_ref[...], preferred_element_type=jnp.float32) + b_ref[...]
    feat = jnp.maximum(y, 0.0)                                    # (TT, HIDDEN) f32
    feat_ref[0] = feat.astype(feat_ref.dtype)

    # classifier: Conv1d(k=1, no bias) == matmul; output padded to 128 lanes.
    cas = jnp.dot(feat.astype(wcls_ref.dtype), wcls_ref[...],
                  preferred_element_type=jnp.float32)             # (TT, NC_PAD) f32

    # ||features||_2 along channels, packed into padded lane column `nc`.
    mag = jnp.sqrt(jnp.sum(feat * feat, axis=-1, keepdims=True))  # (TT, 1) f32
    lane = jax.lax.broadcasted_iota(jnp.int32, cas.shape, 1)
    cas_ref[0] = jnp.where(lane == nc, mag, cas)                  # lane-dense store

    # softmax over the real class columns only (== torch softmax dim=2)
    s = jnp.where(lane < nc, cas, jnp.float32(-1e30))
    m = jnp.max(s, axis=-1, keepdims=True)
    e = jnp.exp(s - m)
    sm_ref[0] = e * pl.reciprocal(jnp.sum(e, axis=-1, keepdims=True), approx=True)


def cas_module_pallas(x, params):
    """Runs the fused CAS kernel over a (B, T_tiles) grid. x: (B, T, C) f32."""
    B, T, C = x.shape
    NC = params["w_cls"].shape[1]
    NC_PAD = ((NC + 1 + LANE - 1) // LANE) * LANE   # >= NC+1, multiple of 128
    TT = T if T <= 256 else 256                     # T tile (multiple of 8 or == T)
    n_t = pl.cdiv(T, TT)

    # 3-tap halo built once in XLA: each row carries [x[t-1], x[t], x[t+1]];
    # tile boundaries therefore see real neighbor data, only global borders are 0.
    x_prev = jnp.pad(x, ((0, 0), (1, 0), (0, 0)))[:, :T, :]
    x_next = jnp.pad(x, ((0, 0), (0, 1), (0, 0)))[:, 1:, :]
    x_cat = jnp.concatenate([x_prev, x, x_next], axis=-1).astype(jnp.bfloat16)

    # Fold BatchNorm (eval mode) + conv bias into the conv weights/bias.
    scale = params["gamma"] * jax.lax.rsqrt(params["var"] + BN_EPS)        # (1, HIDDEN)
    w_fold = (params["w_conv"].reshape(3 * C, HIDDEN) * scale).astype(jnp.bfloat16)
    b_fold = (params["b_conv"] - params["mean"]) * scale + params["beta"]  # (1, HIDDEN) f32

    # Zero-pad classifier weight so cas / softmax output slabs are lane-dense.
    w_cls = jnp.zeros((HIDDEN, NC_PAD), jnp.bfloat16).at[:, :NC].set(
        params["w_cls"].astype(jnp.bfloat16))

    kernel = functools.partial(cas_kernel, nc=NC)
    const = lambda b, t: (0, 0)
    feat, cas_packed, sm_packed = pl.pallas_call(
        kernel,
        out_shape=(
            jax.ShapeDtypeStruct((B, T, HIDDEN), jnp.float32),
            jax.ShapeDtypeStruct((B, T, NC_PAD), jnp.float32),
            jax.ShapeDtypeStruct((B, T, NC_PAD), jnp.float32),
        ),
        grid=(B, n_t),
        in_specs=[
            pl.BlockSpec((1, TT, 3 * C), lambda b, t: (b, t, 0)),   # x with halo taps
            pl.BlockSpec((3 * C, HIDDEN), const),                   # folded conv weight
            pl.BlockSpec((1, HIDDEN), const),                       # folded bias
            pl.BlockSpec((HIDDEN, NC_PAD), const),                  # padded classifier
        ],
        out_specs=(
            pl.BlockSpec((1, TT, HIDDEN), lambda b, t: (b, t, 0)),
            pl.BlockSpec((1, TT, NC_PAD), lambda b, t: (b, t, 0)),
            pl.BlockSpec((1, TT, NC_PAD), lambda b, t: (b, t, 0)),
        ),
        compiler_params=pltpu.CompilerParams(
            dimension_semantics=("parallel", "parallel"),
            vmem_limit_bytes=48 * 1024 * 1024,
        ),
    )(x_cat, w_fold, b_fold, w_cls)

    cas = cas_packed[..., :NC]
    feat_magnitudes = cas_packed[..., NC]       # mag packed in spare lane column
    cas_softmax = sm_packed[..., :NC]
    return feat, cas, feat_magnitudes, cas_softmax


@functools.partial(jax.jit, static_argnames=("r_act", "r_bkg"))
def model_forward(x, params, *, r_act, r_bkg):
    """JAX/Pallas equivalent of Model.forward (eval mode)."""
    B, T, _ = x.shape
    k_act = T // r_act
    k_bkg = T // r_bkg

    features, cas, feat_magnitudes, cas_softmax = cas_module_pallas(x, params)

    # select_idx = dropout(ones) is identity in eval mode -> *_drop == original.
    feat_mag_rev = jnp.max(feat_magnitudes, axis=1, keepdims=True) - feat_magnitudes

    # top-k selection / gather / small softmaxes: plain-JAX glue
    # TODO(synk): sort/gather have no clean Pallas TPU mapping; kept in XLA.
    _, idx_act = jax.lax.top_k(feat_magnitudes, k_act)          # (B, k_act)
    _, idx_bkg = jax.lax.top_k(feat_mag_rev, k_bkg)             # (B, k_bkg)

    feat_act = jnp.take_along_axis(features, idx_act[:, :, None], axis=1)
    feat_bkg = jnp.take_along_axis(features, idx_bkg[:, :, None], axis=1)

    sorted_scores = -jnp.sort(-cas, axis=1)                     # descending over T, per class
    score_act = jnp.mean(sorted_scores[:, :k_act, :], axis=1)   # (B, NC)
    score_bkg = jnp.mean(jnp.take_along_axis(cas, idx_bkg[:, :, None], axis=1), axis=1)

    score_act = jax.nn.softmax(score_act, axis=1)
    score_bkg = jax.nn.softmax(score_bkg, axis=1)

    return score_act, score_bkg, feat_act, feat_bkg, features, cas_softmax


def init_params(key, len_feature, num_classes):
    """Deterministic parameter init mirroring the module shapes.
    Conv weights ~ kaiming_normal, BN gamma=1 / beta=0, running mean/var = 0/1.
    w_conv is stored tap-major (k, C_in, C_out); a torch Conv1d weight
    (C_out, C_in, k) maps to it via transpose(2, 1, 0)."""
    k1, k2, k3 = jax.random.split(key, 3)
    fan_in_conv = len_feature * 3
    w_conv = (jax.random.normal(k1, (3, len_feature, HIDDEN), jnp.float32)
              * jnp.sqrt(2.0 / fan_in_conv))
    b_conv = (jax.random.uniform(k2, (1, HIDDEN), jnp.float32, -1.0, 1.0)
              / jnp.sqrt(float(fan_in_conv)))
    w_cls = (jax.random.normal(k3, (HIDDEN, num_classes), jnp.float32)
             * jnp.sqrt(2.0 / HIDDEN))
    return {
        "w_conv": w_conv,
        "b_conv": b_conv,
        "gamma": jnp.ones((1, HIDDEN), jnp.float32),
        "beta": jnp.zeros((1, HIDDEN), jnp.float32),
        "mean": jnp.zeros((1, HIDDEN), jnp.float32),
        "var": jnp.ones((1, HIDDEN), jnp.float32),
        "w_cls": w_cls,
    }


if __name__ == "__main__":
    B, T, LEN_FEATURE, NUM_CLASSES = 2, 8, 32, 4
    R_ACT, R_BKG = 2, 4

    key = jax.random.PRNGKey(0)
    kx, kp = jax.random.split(key)
    x = jax.random.normal(kx, (B, T, LEN_FEATURE), jnp.float32)
    params = init_params(kp, LEN_FEATURE, NUM_CLASSES)

    outs = model_forward(x, params, r_act=R_ACT, r_bkg=R_BKG)
    outs = jax.block_until_ready(outs)

    score_act, score_bkg, feat_act, feat_bkg, features, cas_softmax = outs
    assert score_act.shape == (B, NUM_CLASSES)
    assert score_bkg.shape == (B, NUM_CLASSES)
    assert feat_act.shape == (B, T // R_ACT, HIDDEN)
    assert feat_bkg.shape == (B, T // R_BKG, HIDDEN)
    assert features.shape == (B, T, HIDDEN)
    assert cas_softmax.shape == (B, T, NUM_CLASSES)
    assert bool(jnp.all(jnp.isfinite(score_act)))
    assert bool(jnp.all(jnp.isfinite(score_bkg)))
    assert bool(jnp.all(jnp.abs(jnp.sum(cas_softmax, axis=-1) - 1.0) < 1e-2))
    print("KERNEL_OK")
</pallas_src>

<mosaic_0001>
module attributes {stable_mosaic.version = 11 : i64} {
  func.func @cas_kernel(%arg0: i32, %arg1: i32, %arg2: memref<1x8x96xbf16, #tpu.memory_space<vmem>>, %arg3: memref<96x2048xbf16, #tpu.memory_space<vmem>>, %arg4: memref<1x2048xf32, #tpu.memory_space<vmem>>, %arg5: memref<2048x128xbf16, #tpu.memory_space<vmem>>, %arg6: memref<1x8x2048xf32, #tpu.memory_space<vmem>>, %arg7: memref<1x8x128xf32, #tpu.memory_space<vmem>>, %arg8: memref<1x8x128xf32, #tpu.memory_space<vmem>>) attributes {dimension_semantics = [#tpu.dimension_semantics<parallel>, #tpu.dimension_semantics<parallel>], iteration_bounds = array<i64: 2, 1>, scalar_prefetch = 0 : i64, scratch_operands = 0 : i64, tpu.core_type = #tpu.core_type<tc>, window_params = [{transform_indices = @transform_0, window_bounds = array<i64: 1, 8, 96>}, {pipeline_mode = #tpu.pipeline_mode<synchronous>, transform_indices = @transform_1, window_bounds = array<i64: 96, 2048>}, {pipeline_mode = #tpu.pipeline_mode<synchronous>, transform_indices = @transform_2, window_bounds = array<i64: 1, 2048>}, {pipeline_mode = #tpu.pipeline_mode<synchronous>, transform_indices = @transform_3, window_bounds = array<i64: 2048, 128>}, {transform_indices = @transform_4, window_bounds = array<i64: 1, 8, 2048>}, {transform_indices = @transform_5, window_bounds = array<i64: 1, 8, 128>}, {transform_indices = @transform_6, window_bounds = array<i64: 1, 8, 128>}]} {
    %c0 = arith.constant 0 : index
    %c0_0 = arith.constant 0 : index
    %c0_1 = arith.constant 0 : index
    %0 = vector.load %arg2[%c0, %c0_0, %c0_1] : memref<1x8x96xbf16, #tpu.memory_space<vmem>>, vector<1x8x96xbf16>
    %1 = vector.shape_cast %0 : vector<1x8x96xbf16> to vector<8x96xbf16>
    %c0_2 = arith.constant 0 : index
    %c0_3 = arith.constant 0 : index
    %2 = vector.load %arg3[%c0_2, %c0_3] : memref<96x2048xbf16, #tpu.memory_space<vmem>>, vector<96x2048xbf16>
    %cst = arith.constant dense<0.000000e+00> : vector<8x2048xf32>
    %3 = tpu.matmul %1, %2, %cst {dimension_numbers = #tpu.dot_dimension_numbers<[1], [0], [0], [1], [0, 0, 1, 1], [], []>} : vector<8x96xbf16>, vector<96x2048xbf16>, vector<8x2048xf32> -> vector<8x2048xf32>
    %c0_4 = arith.constant 0 : index
    %c0_5 = arith.constant 0 : index
    %4 = vector.load %arg4[%c0_4, %c0_5] : memref<1x2048xf32, #tpu.memory_space<vmem>>, vector<1x2048xf32>
    %5 = vector.broadcast %4 : vector<1x2048xf32> to vector<8x2048xf32>
    %6 = arith.addf %3, %5 : vector<8x2048xf32>
    %cst_6 = arith.constant 0.000000e+00 : f32
    %7 = vector.broadcast %cst_6 : f32 to vector<8x2048xf32>
    %8 = arith.maximumf %6, %7 : vector<8x2048xf32>
    %c0_7 = arith.constant 0 : index
    %c0_8 = arith.constant 0 : index
    %c0_9 = arith.constant 0 : index
    %9 = vector.load %arg6[%c0_7, %c0_8, %c0_9] : memref<1x8x2048xf32, #tpu.memory_space<vmem>>, vector<1x8x2048xf32>
    %10 = vector.shape_cast %9 : vector<1x8x2048xf32> to vector<8x2048xf32>
    %11 = vector.shape_cast %8 : vector<8x2048xf32> to vector<1x8x2048xf32>
    tpu.vector_store %arg6[%c0_7, %c0_8, %c0_9], %11 {strides = array<i32>} : memref<1x8x2048xf32, #tpu.memory_space<vmem>>, vector<1x8x2048xf32>,
    %12 = arith.truncf %8 : vector<8x2048xf32> to vector<8x2048xbf16>
    %c0_10 = arith.constant 0 : index
    %c0_11 = arith.constant 0 : index
    %13 = vector.load %arg5[%c0_10, %c0_11] : memref<2048x128xbf16, #tpu.memory_space<vmem>>, vector<2048x128xbf16>
    %cst_12 = arith.constant dense<0.000000e+00> : vector<8x128xf32>
    %14 = tpu.matmul %12, %13, %cst_12 {dimension_numbers = #tpu.dot_dimension_numbers<[1], [0], [0], [1], [0, 0, 1, 1], [], []>} : vector<8x2048xbf16>, vector<2048x128xbf16>, vector<8x128xf32> -> vector<8x128xf32>
    %15 = arith.mulf %8, %8 : vector<8x2048xf32>
    %cst_13 = arith.constant dense<0.000000e+00> : vector<8xf32>
    %16 = vector.multi_reduction <add>, %15, %cst_13 [1] : vector<8x2048xf32> to vector<8xf32>
    %17 = vector.shape_cast %16 : vector<8xf32> to vector<8x1xf32>
    %18 = math.sqrt %17 : vector<8x1xf32>
    %19 = tpu.iota {dimensions = array<i32: 1>} : vector<8x128xi32>
    %c4_i32 = arith.constant 4 : i32
    %20 = vector.broadcast %c4_i32 : i32 to vector<8x128xi32>
    %21 = arith.cmpi eq, %19, %20 : vector<8x128xi32>
    %22 = vector.shape_cast %18 : vector<8x1xf32> to vector<8x1xf32>
    %23 = vector.broadcast %22 : vector<8x1xf32> to vector<8x128xf32>
    %24 = arith.select %21, %23, %14 : vector<8x128xi1>, vector<8x128xf32>
    %c0_14 = arith.constant 0 : index
    %c0_15 = arith.constant 0 : index
    %c0_16 = arith.constant 0 : index
    %25 = vector.load %arg7[%c0_14, %c0_15, %c0_16] : memref<1x8x128xf32, #tpu.memory_space<vmem>>, vector<1x8x128xf32>
    %26 = vector.shape_cast %25 : vector<1x8x128xf32> to vector<8x128xf32>
    %27 = vector.shape_cast %24 : vector<8x128xf32> to vector<1x8x128xf32>
    tpu.vector_store %arg7[%c0_14, %c0_15, %c0_16], %27 {strides = array<i32>} : memref<1x8x128xf32, #tpu.memory_space<vmem>>, vector<1x8x128xf32>,
    %c4_i32_17 = arith.constant 4 : i32
    %28 = vector.broadcast %c4_i32_17 : i32 to vector<8x128xi32>
    %29 = arith.cmpi slt, %19, %28 : vector<8x128xi32>
    %cst_18 = arith.constant -1.000000e+30 : f32
    %30 = vector.broadcast %cst_18 : f32 to vector<8x128xf32>
    %31 = arith.select %29, %14, %30 : vector<8x128xi1>, vector<8x128xf32>
    %cst_19 = arith.constant dense<0xFF800000> : vector<8xf32>
    %32 = vector.multi_reduction <maximumf>, %31, %cst_19 [1] : vector<8x128xf32> to vector<8xf32>
    %33 = vector.shape_cast %32 : vector<8xf32> to vector<8x1xf32>
    %34 = vector.broadcast %33 : vector<8x1xf32> to vector<8x128xf32>
    %35 = arith.subf %31, %34 : vector<8x128xf32>
    %36 = math.exp %35 : vector<8x128xf32>
    %cst_20 = arith.constant dense<0.000000e+00> : vector<8xf32>
    %37 = vector.multi_reduction <add>, %36, %cst_20 [1] : vector<8x128xf32> to vector<8xf32>
    %38 = vector.shape_cast %37 : vector<8xf32> to vector<8x1xf32>
    %39 = tpu.reciprocal %38 {approx = true} : vector<8x1xf32> -> vector<8x1xf32>
    %40 = vector.broadcast %39 : vector<8x1xf32> to vector<8x128xf32>
    %41 = arith.mulf %36, %40 : vector<8x128xf32>
    %c0_21 = arith.constant 0 : index
    %c0_22 = arith.constant 0 : index
    %c0_23 = arith.constant 0 : index
    %42 = vector.load %arg8[%c0_21, %c0_22, %c0_23] : memref<1x8x128xf32, #tpu.memory_space<vmem>>, vector<1x8x128xf32>
    %43 = vector.shape_cast %42 : vector<1x8x128xf32> to vector<8x128xf32>
    %44 = vector.shape_cast %41 : vector<8x128xf32> to vector<1x8x128xf32>
    tpu.vector_store %arg8[%c0_21, %c0_22, %c0_23], %44 {strides = array<i32>} : memref<1x8x128xf32, #tpu.memory_space<vmem>>, vector<1x8x128xf32>,
    return
  }
  func.func @transform_0(%arg0: i32, %arg1: i32) -> (i32, i32, i32) {
    %c0_i32 = arith.constant 0 : i32
    %c0_i32_0 = arith.constant 0 : i32
    return %arg0, %arg1, %c0_i32 : i32, i32, i32
  }
  func.func @transform_1(%arg0: i32, %arg1: i32) -> (i32, i32) {
    %c0_i32 = arith.constant 0 : i32
    %c0_i32_0 = arith.constant 0 : i32
    %c0_i32_1 = arith.constant 0 : i32
    return %c0_i32, %c0_i32_0 : i32, i32
  }
  func.func @transform_2(%arg0: i32, %arg1: i32) -> (i32, i32) {
    %c0_i32 = arith.constant 0 : i32
    %c0_i32_0 = arith.constant 0 : i32
    %c0_i32_1 = arith.constant 0 : i32
    return %c0_i32, %c0_i32_0 : i32, i32
  }
  func.func @transform_3(%arg0: i32, %arg1: i32) -> (i32, i32) {
    %c0_i32 = arith.constant 0 : i32
    %c0_i32_0 = arith.constant 0 : i32
    %c0_i32_1 = arith.constant 0 : i32
    return %c0_i32, %c0_i32_0 : i32, i32
  }
  func.func @transform_4(%arg0: i32, %arg1: i32) -> (i32, i32, i32) {
    %c0_i32 = arith.constant 0 : i32
    %c0_i32_0 = arith.constant 0 : i32
    return %arg0, %arg1, %c0_i32 : i32, i32, i32
  }
  func.func @transform_5(%arg0: i32, %arg1: i32) -> (i32, i32, i32) {
    %c0_i32 = arith.constant 0 : i32
    %c0_i32_0 = arith.constant 0 : i32
    return %arg0, %arg1, %c0_i32 : i32, i32, i32
  }
  func.func @transform_6(%arg0: i32, %arg1: i32) -> (i32, i32, i32) {
    %c0_i32 = arith.constant 0 : i32
    %c0_i32_0 = arith.constant 0 : i32
    return %arg0, %arg1, %c0_i32 : i32, i32, i32
  }
}

</mosaic_0001>

<bundles_post_ra>
// kernel: model_forward.1
= control target key start
LH: loop header
LB: loop body
LE: loop exit
PB: predicated region body
PF: predicated region fallthrough
CT: control target
= control target key end

     0   :  { %s3570_s21 = smov 0   ;;  %s3572_s22 = smov 0   ;;  %s4444_s0 = inlined_call_operand.vmem [shape: bf16[2,8,96], index: 0, kind: input, shape index: {}]   ;;  %s4445_s1 = inlined_call_operand.vmem [shape: bf16[96,2048], index: 1, kind: input, shape index: {}]   ;;  %s4446_s2 = inlined_call_operand.vmem [shape: f32[1,2048], index: 2, kind: input, shape index: {}]   ;;  %s4447_s3 = inlined_call_operand.vmem [shape: bf16[2048,128], index: 3, kind: input, shape index: {}]   ;;  %s4448_s4 = inlined_call_operand.vmem [shape: f32[2,8,2048], index: 4, kind: output, shape index: {0}]   ;;  %s4449_s5 = inlined_call_operand.vmem [shape: f32[2,8,128], index: 5, kind: output, shape index: {1}]   ;;  %s4450_s6 = inlined_call_operand.vmem [shape: f32[2,8,128], index: 6, kind: output, shape index: {2}]  }
   0x1   :  { %s3574_s23 = smov 0  }
   0x2 LB: > { %s29_s24 = sadd.s32 1, %s3528_s22  ;;  %p2934_p0 = scmp.ge.s32.totalorder %s3532_s23, 1  ;;  %s3532_s23 = sphi %s3574_s23, %s17_s23   ;;  %s3528_s22 = sphi %s3572_s22, %s4452_s22   ;;  %s3524_s21 = sphi %s3570_s21, %s4451_s21  }
   0x3   : > { %p31_p1 = scmp.ge.s32.totalorder %s29_s24, 2  ;;  %p239_p2 = scmp.lt.s32.totalorder %s3532_s23, 3 }
   0x5   : > { %s4454_s24 = smov (%p31_p1, %s29_s24), 0  ;;  %p240_p3 = pnand %p2934_p0, %p239_p2 }
   0x6   : > { %v321_v0 = vld [vmem:[%s4445_s1] sm:$0xff] (!%p240_p3)  ;;  %v322_v2 = vld [vmem:[%s4445_s1 + $0x8] sm:$0xff] (!%p240_p3)  ;;  %v3534_v8 = vmov (!%p240_p3), 0   ;;  %p289_p4 = scmp.lt.s32.totalorder (!%p240_p3), %s3524_s21, 1  ;;  %v323_v47 = vld [vmem:[%s4445_s1 + $0x10] sm:$0xff] (!%p240_p3)  ;;  %vm981_vm0 = vcmask (!%p240_p3), 785408  }
   0x7   : > { %243 = sbr.rel (%p240_p3) target bundleno = 883 (0x373), region = 36  ;;  %v329_v1 = vld [vmem:[%s4445_s1 + $0x40] sm:$0xff] (!%p240_p3)  ;;  %v330_v4 = vld [vmem:[%s4445_s1 + $0x48] sm:$0xff] (!%p240_p3)  ;;  %1017 = vmatprep.mubr.bf16.mxu0 (!%p240_p3), %v3534_v8  ;;  %1058 = vmatprep.mubr.bf16.mxu1 (!%p240_p3), %v3534_v8  ;;  %v331_v48 = vld [vmem:[%s4445_s1 + $0x50] sm:$0xff] (!%p240_p3) }
   0x8   : > { %v2941_v3 = vcombine.high (!%p240_p3), %v321_v0, %v329_v1  ;;  %v2940_v5 = vcombine.low (!%p240_p3), %v321_v0, %v329_v1  ;;  %v337_v6 = vld [vmem:[%s4445_s1 + $0x80] sm:$0xff] (!%p240_p3)  ;;  %v2943_v9 = vcombine.high (!%p240_p3), %v322_v2, %v330_v4  ;;  %v2942_v10 = vcombine.low (!%p240_p3), %v322_v2, %v330_v4  ;;  %v338_v12 = vld [vmem:[%s4445_s1 + $0x88] sm:$0xff] (!%p240_p3)  ;;  %v324_v49 = vld [vmem:[%s4445_s1 + $0x18] sm:$0xff] (!%p240_p3) }
   0x9   : > { %v345_v7 = vld [vmem:[%s4445_s1 + $0xc0] sm:$0xff] (!%p240_p3)  ;;  %v346_v13 = vld [vmem:[%s4445_s1 + $0xc8] sm:$0xff] (!%p240_p3)  ;;  %v332_v50 = vld [vmem:[%s4445_s1 + $0x58] sm:$0xff] (!%p240_p3)  ;;  %v2945_v53 = vcombine.high (!%p240_p3), %v323_v47, %v331_v48  ;;  %v2944_v60 = vcombine.low (!%p240_p3), %v323_v47, %v331_v48 }
   0xa   : > { %v2957_v11 = vcombine.high (!%p240_p3), %v337_v6, %v345_v7  ;;  %v353_v14 = vld [vmem:[%s4445_s1 + $0x100] sm:$0xff] (!%p240_p3)  ;;  %985 = vmatprep.subr.bf16.mxu0 (!%p240_p3), %v2941_v3  ;;  %v2959_v15 = vcombine.high (!%p240_p3), %v338_v12, %v346_v13  ;;  %v354_v17 = vld [vmem:[%s4445_s1 + $0x108] sm:$0xff] (!%p240_p3)  ;;  %1026 = vmatprep.subr.bf16.mxu1 (!%p240_p3), %v2943_v9  ;;  %v2956_v19 = vcombine.low (!%p240_p3), %v337_v6, %v345_v7  ;;  %v339_v54 = vld [vmem:[%s4445_s1 + $0x90] sm:$0xff] (!%p240_p3) }
   0xb   : > { %v361_v16 = vld [vmem:[%s4445_s1 + $0x140] sm:$0xff] (!%p240_p3)  ;;  %v362_v18 = vld [vmem:[%s4445_s1 + $0x148] sm:$0xff] (!%p240_p3)  ;;  %986 = vmatpush1.bf16.msra.mxu0 (!%p240_p3), %v2940_v5  ;;  %1027 = vmatpush1.bf16.msra.mxu1 (!%p240_p3), %v2942_v10  ;;  %v2958_v20 = vcombine.low (!%p240_p3), %v338_v12, %v346_v13  ;;  %v347_v55 = vld [vmem:[%s4445_s1 + $0xd0] sm:$0xff] (!%p240_p3)  ;;  %v2947_v56 = vcombine.high (!%p240_p3), %v324_v49, %v332_v50  ;;  %v2946_v62 = vcombine.low (!%p240_p3), %v324_v49, %v332_v50 }
   0xc   : > { %987 = vmatprep.subr.bf16.mxu0 (!%p240_p3), %v2957_v11  ;;  %v2973_v21 = vcombine.high (!%p240_p3), %v353_v14, %v361_v16  ;;  %1028 = vmatprep.subr.bf16.mxu1 (!%p240_p3), %v2959_v15  ;;  %v2975_v22 = vcombine.high (!%p240_p3), %v354_v17, %v362_v18  ;;  %v369_v23 = vld [vmem:[%s4445_s1 + $0x180] sm:$0xff] (!%p240_p3)  ;;  %v370_v25 = vld [vmem:[%s4445_s1 + $0x188] sm:$0xff] (!%p240_p3)  ;;  %v2972_v27 = vcombine.low (!%p240_p3), %v353_v14, %v361_v16  ;;  %v340_v57 = vld [vmem:[%s4445_s1 + $0x98] sm:$0xff] (!%p240_p3) }
   0xd   : > { %v377_v24 = vld [vmem:[%s4445_s1 + $0x1c0] sm:$0xff] (!%p240_p3)  ;;  %v378_v26 = vld [vmem:[%s4445_s1 + $0x1c8] sm:$0xff] (!%p240_p3)  ;;  %v2974_v28 = vcombine.low (!%p240_p3), %v354_v17, %v362_v18  ;;  %v348_v58 = vld [vmem:[%s4445_s1 + $0xd8] sm:$0xff] (!%p240_p3)  ;;  %v2961_v61 = vcombine.high (!%p240_p3), %v339_v54, %v347_v55  ;;  %v2960_v4 = vcombine.low (!%p240_p3), %v339_v54, %v347_v55 }
   0xe   : > { %v2989_v29 = vcombine.high %v369_v23, %v377_v24  ;;  %v2991_v30 = vcombine.high %v370_v25, %v378_v26  ;;  %v385_v31 = vld [vmem:[%s4445_s1 + $0x200] sm:$0xff]  ;;  %v386_v33 = vld [vmem:[%s4445_s1 + $0x208] sm:$0xff]  ;;  %v2988_v35 = vcombine.low %v369_v23, %v377_v24  ;;  %v2990_v36 = vcombine.low %v370_v25, %v378_v26  ;;  %s4456_s21 = smov (!%p289_p4, %s3524_s21), 1  ;;  %v355_v63 = vld [vmem:[%s4445_s1 + $0x110] sm:$0xff] }
   0xf   : > { %988 = vmatpush1.bf16.msra.mxu0 %v2956_v19  ;;  %1029 = vmatpush1.bf16.msra.mxu1 %v2958_v20  ;;  %v393_v32 = vld [vmem:[%s4445_s1 + $0x240] sm:$0xff]  ;;  %v394_v34 = vld [vmem:[%s4445_s1 + $0x248] sm:$0xff]  ;;  %s2935_s9 = sshll.u32 %s4456_s21, 2  ;;  %v363_v0 = vld [vmem:[%s4445_s1 + $0x150] sm:$0xff]  ;;  %v2963_v1 = vcombine.high %v340_v57, %v348_v58  ;;  %v2962_v6 = vcombine.low %v340_v57, %v348_v58  ;;  %s3174_s7 = sshll.u32 %s4456_s21, 7 }
  0x10   : > { %989 = vmatprep.subr.bf16.mxu0 %v2973_v21  ;;  %1030 = vmatprep.subr.bf16.mxu1 %v2975_v22  ;;  %v3005_v37 = vcombine.high %v385_v31, %v393_v32  ;;  %v3007_v38 = vcombine.high %v386_v33, %v394_v34  ;;  %v401_v39 = vld [vmem:[%s4445_s1 + $0x280] sm:$0xff]  ;;  %v402_v41 = vld [vmem:[%s4445_s1 + $0x288] sm:$0xff]  ;;  %v3004_v43 = vcombine.low %v385_v31, %v393_v32  ;;  %s295_s20 = scalar_lea.vmem %s4444_s0, %s2935_s9  ;;  %v356_v2 = vld [vmem:[%s4445_s1 + $0x118] sm:$0xff]  ;;  %s4042_s10 = scalar_lea.vmem %s4448_s4, %s3174_s7 }
  0x11   : > { %v409_v40 = vld [vmem:[%s4445_s1 + $0x2c0] sm:$0xff]  ;;  %v410_v42 = vld [vmem:[%s4445_s1 + $0x2c8] sm:$0xff]  ;;  %v3006_v44 = vcombine.low %v386_v33, %v394_v34  ;;  %v364_v3 = vld [vmem:[%s4445_s1 + $0x158] sm:$0xff]  ;;  %v2977_v5 = vcombine.high %v355_v63, %v363_v0  ;;  %v2976_v13 = vcombine.low %v355_v63, %v363_v0  ;;  %s2938_s8 = sshll.u32 %s4456_s21, 3 }
  0x12   : > { %v3021_v45 = vcombine.high %v401_v39, %v409_v40  ;;  %v3023_v46 = vcombine.high %v402_v41, %v410_v42  ;;  %v3020_v51 = vcombine.low %v401_v39, %v409_v40  ;;  %v3022_v52 = vcombine.low %v402_v41, %v410_v42  ;;  %v3696_v59 = vld [vmem:[%s295_s20] sm:$0xf]  ;;  %v371_v7 = vld [vmem:[%s4445_s1 + $0x190] sm:$0xff]  ;;  %v372_v11 = vld [vmem:[%s4445_s1 + $0x198] sm:$0xff]  ;;  %s311_s12 = scalar_lea.vmem %s4449_s5, %s2938_s8  ;;  %s318_s21 = scalar_lea.vmem %s4450_s6, %s2938_s8 }
  0x13   : > { %990 = vmatpush1.bf16.msra.mxu0 %v2972_v27  ;;  %1031 = vmatpush1.bf16.msra.mxu1 %v2974_v28  ;;  %v379_v9 = vld [vmem:[%s4445_s1 + $0x1d0] sm:$0xff]  ;;  %v2979_v10 = vcombine.high %v356_v2, %v364_v3  ;;  %v380_v12 = vld [vmem:[%s4445_s1 + $0x1d8] sm:$0xff]  ;;  %v2978_v16 = vcombine.low %v356_v2, %v364_v3  ;;  %v333_v33 = vld [vmem:[%s4445_s1 + $0x60] sm:$0xff] }
  0x14   : > { %991 = vmatprep.subr.bf16.mxu0 %v2989_v29  ;;  %1032 = vmatprep.subr.bf16.mxu1 %v2991_v30  ;;  %v387_v14 = vld [vmem:[%s4445_s1 + $0x210] sm:$0xff]  ;;  %v2993_v15 = vcombine.high %v371_v7, %v379_v9  ;;  %v2995_v18 = vcombine.high %v372_v11, %v380_v12  ;;  %v388_v19 = vld [vmem:[%s4445_s1 + $0x218] sm:$0xff]  ;;  %v2992_v21 = vcombine.low %v371_v7, %v379_v9  ;;  %v325_v30 = vld [vmem:[%s4445_s1 + $0x20] sm:$0xff] }
  0x15   : > { %v395_v17 = vld [vmem:[%s4445_s1 + $0x250] sm:$0xff]  ;;  %v396_v20 = vld [vmem:[%s4445_s1 + $0x258] sm:$0xff]  ;;  %v2994_v24 = vcombine.low %v372_v11, %v380_v12  ;;  %v2949_v40 = vcombine.high %v325_v30, %v333_v33  ;;  %v349_v41 = vld [vmem:[%s4445_s1 + $0xe0] sm:$0xff] }
  0x16   : > { %v403_v22 = vld [vmem:[%s4445_s1 + $0x290] sm:$0xff]  ;;  %v3009_v23 = vcombine.high %v387_v14, %v395_v17  ;;  %v3011_v26 = vcombine.high %v388_v19, %v396_v20  ;;  %v404_v27 = vld [vmem:[%s4445_s1 + $0x298] sm:$0xff]  ;;  %v3008_v29 = vcombine.low %v387_v14, %v395_v17  ;;  %v3010_v32 = vcombine.low %v388_v19, %v396_v20  ;;  %v365_v49 = vld [vmem:[%s4445_s1 + $0x160] sm:$0xff] }
  0x17   : > { %992 = vmatpush1.bf16.msra.mxu0 %v2988_v35  ;;  %1033 = vmatpush1.bf16.msra.mxu1 %v2990_v36  ;;  %v411_v25 = vld [vmem:[%s4445_s1 + $0x2d0] sm:$0xff]  ;;  %v412_v28 = vld [vmem:[%s4445_s1 + $0x2d8] sm:$0xff]  ;;  %v326_v35 = vld [vmem:[%s4445_s1 + $0x28] sm:$0xff] }
  0x18   : > { %993 = vmatprep.subr.bf16.mxu0 %v3005_v37  ;;  %1034 = vmatprep.subr.bf16.mxu1 %v3007_v38  ;;  %v3025_v31 = vcombine.high %v403_v22, %v411_v25  ;;  %v3027_v34 = vcombine.high %v404_v27, %v412_v28  ;;  %v334_v36 = vld [vmem:[%s4445_s1 + $0x68] sm:$0xff]  ;;  %v3024_v37 = vcombine.low %v403_v22, %v411_v25  ;;  %v341_v38 = vld [vmem:[%s4445_s1 + $0xa0] sm:$0xff]  ;;  %v335_v17 = vld [vmem:[%s4445_s1 + $0x70] sm:$0xff] }
  0x19   : > { %v3026_v39 = vcombine.low %v404_v27, %v412_v28  ;;  %v2951_v42 = vcombine.high %v326_v35, %v334_v36  ;;  %v2965_v47 = vcombine.high %v341_v38, %v349_v41  ;;  %v2950_v48 = vcombine.low %v326_v35, %v334_v36  ;;  %v373_v54 = vld [vmem:[%s4445_s1 + $0x1a0] sm:$0xff]  ;;  %v390_v3 = vld [vmem:[%s4445_s1 + $0x228] sm:$0xff]  ;;  %v328_v20 = vld [vmem:[%s4445_s1 + $0x38] sm:$0xff] }
  0x1a   : > { %v381_v57 = vld [vmem:[%s4445_s1 + $0x1e0] sm:$0xff]  ;;  %v406_v12 = vld [vmem:[%s4445_s1 + $0x2a8] sm:$0xff]  ;;  %v351_v25 = vld [vmem:[%s4445_s1 + $0xf0] sm:$0xff] }
  0x1b   : > { %994 = vmatpush1.bf16.msra.mxu0 %v3004_v43  ;;  %1035 = vmatpush1.bf16.msra.mxu1 %v3006_v44  ;;  %v342_v43 = vld [vmem:[%s4445_s1 + $0xa8] sm:$0xff]  ;;  %v389_v63 = vld [vmem:[%s4445_s1 + $0x220] sm:$0xff]  ;;  %v344_v28 = vld [vmem:[%s4445_s1 + $0xb8] sm:$0xff] }
  0x1c   : > { %995 = vmatprep.subr.bf16.mxu0 %v3021_v45  ;;  %1036 = vmatprep.subr.bf16.mxu1 %v3023_v46  ;;  %v350_v44 = vld [vmem:[%s4445_s1 + $0xe8] sm:$0xff]  ;;  %v2948_v45 = vcombine.low %v325_v30, %v333_v33  ;;  %v357_v46 = vld [vmem:[%s4445_s1 + $0x120] sm:$0xff]  ;;  %v367_v33 = vld [vmem:[%s4445_s1 + $0x170] sm:$0xff] }
  0x1d   : > { %v2967_v50 = vcombine.high %v342_v43, %v350_v44  ;;  %v2981_v55 = vcombine.high %v357_v46, %v365_v49  ;;  %v397_v0 = vld [vmem:[%s4445_s1 + $0x260] sm:$0xff]  ;;  %v360_v36 = vld [vmem:[%s4445_s1 + $0x138] sm:$0xff] }
  0x1e   : > { %v405_v7 = vld [vmem:[%s4445_s1 + $0x2a0] sm:$0xff] }
  0x1f   : > { %996 = vmatpush1.bf16.msra.mxu0 %v3020_v51  ;;  %1037 = vmatpush1.bf16.msra.mxu1 %v3022_v52  ;;  %v358_v51 = vld [vmem:[%s4445_s1 + $0x128] sm:$0xff]  ;;  %v413_v9 = vld [vmem:[%s4445_s1 + $0x2e0] sm:$0xff] }
  0x20   : > { %1067 = vmatprep.subr.bf16.mxu0 %v2945_v53  ;;  %1108 = vmatprep.subr.bf16.mxu1 %v2947_v56  ;;  %v366_v52 = vld [vmem:[%s4445_s1 + $0x168] sm:$0xff]  ;;  %v2964_v53 = vcombine.low %v341_v38, %v349_v41  ;;  %v2966_v56 = vcombine.low %v342_v43, %v350_v44  ;;  %v383_v41 = vld [vmem:[%s4445_s1 + $0x1f0] sm:$0xff]  ;;  %v376_v44 = vld [vmem:[%s4445_s1 + $0x1b8] sm:$0xff] }
  0x21   : > { %v2983_v58 = vcombine.high %v358_v51, %v366_v52  ;;  %v2982_v2 = vcombine.low %v358_v51, %v366_v52  ;;  %v392_v52 = vld [vmem:[%s4445_s1 + $0x238] sm:$0xff] }
  0x22   : > { %3036 = vmatmul.mubr.msk.bf16.vlgmr.msra.gmra.mrb[0].mxu0 %vm981_vm0, %v3696_v59  ;;  %3037 = vmatmul.mubr.msk.bf16.vlgmr.msra.gmra.mrb[0].mxu1 %vm981_vm0, %v3696_v59 }
  0x23   : > { %1068 = vmatpush1.bf16.msra.mxu0 %v2944_v60  ;;  %1109 = vmatpush1.bf16.msra.mxu1 %v2946_v62  ;;  %v374_v60 = vld [vmem:[%s4445_s1 + $0x1a8] sm:$0xff]  ;;  %v2980_v62 = vcombine.low %v357_v46, %v365_v49  ;;  %v399_v49 = vld [vmem:[%s4445_s1 + $0x270] sm:$0xff] }
  0x24   : > { %1069 = vmatprep.subr.bf16.mxu0 %v2961_v61  ;;  %1110 = vmatprep.subr.bf16.mxu1 %v2963_v1  ;;  %v382_v61 = vld [vmem:[%s4445_s1 + $0x1e8] sm:$0xff]  ;;  %v2997_v1 = vcombine.high %v373_v54, %v381_v57 }
  0x25   : > { %1099 = vmatprep.mubr.bf16.mxu0 %v3534_v8  ;;  %1140 = vmatprep.mubr.bf16.mxu1 %v3534_v8  ;;  %v2998_v11 = vcombine.low %v374_v60, %v382_v61 }
  0x27   : > { %1070 = vmatpush1.bf16.msra.mxu0 %v2960_v4  ;;  %1111 = vmatpush1.bf16.msra.mxu1 %v2962_v6  ;;  %v398_v4 = vld [vmem:[%s4445_s1 + $0x268] sm:$0xff]  ;;  %v2996_v6 = vcombine.low %v373_v54, %v381_v57 }
  0x28   : > { %1071 = vmatprep.subr.bf16.mxu0 %v2977_v5  ;;  %1112 = vmatprep.subr.bf16.mxu1 %v2979_v10  ;;  %v2999_v5 = vcombine.high %v374_v60, %v382_v61  ;;  %v3013_v10 = vcombine.high %v389_v63, %v397_v0  ;;  %v3015_v14 = vcombine.high %v390_v3, %v398_v4  ;;  %v408_v60 = vld [vmem:[%s4445_s1 + $0x2b8] sm:$0xff] }
  0x29   : > { %v3014_v19 = vcombine.low %v390_v3, %v398_v4  ;;  %v416_v61 = vld [vmem:[%s4445_s1 + $0x2f8] sm:$0xff]  ;;  %v3376_v3 = vld [vmem:[%s4447_s3 + $0x40] sm:$0xff]  }
  0x2b   : > { %1072 = vmatpush1.bf16.msra.mxu0 %v2976_v13  ;;  %1113 = vmatpush1.bf16.msra.mxu1 %v2978_v16  ;;  %v414_v13 = vld [vmem:[%s4445_s1 + $0x2e8] sm:$0xff]  ;;  %v327_v16 = vld [vmem:[%s4445_s1 + $0x30] sm:$0xff] }
  0x2c   : > { %1073 = vmatprep.subr.bf16.mxu0 %v2993_v15  ;;  %1114 = vmatprep.subr.bf16.mxu1 %v2995_v18  ;;  %v3012_v15 = vcombine.low %v389_v63, %v397_v0  ;;  %v3029_v18 = vcombine.high %v405_v7, %v413_v9  ;;  %v3031_v22 = vcombine.high %v406_v12, %v414_v13 }
  0x2d   : > { %v2953_v27 = vcombine.high %v327_v16, %v335_v17 }
  0x2f   : > { %1074 = vmatpush1.bf16.msra.mxu0 %v2992_v21  ;;  %1115 = vmatpush1.bf16.msra.mxu1 %v2994_v24  ;;  %v336_v21 = vld [vmem:[%s4445_s1 + $0x78] sm:$0xff]  ;;  %v343_v24 = vld [vmem:[%s4445_s1 + $0xb0] sm:$0xff] }
  0x30   : > { %1075 = vmatprep.subr.bf16.mxu0 %v3009_v23  ;;  %1116 = vmatprep.subr.bf16.mxu1 %v3011_v26  ;;  %v3028_v23 = vcombine.low %v405_v7, %v413_v9  ;;  %v3030_v26 = vcombine.low %v406_v12, %v414_v13  ;;  %v2955_v30 = vcombine.high %v328_v20, %v336_v21  ;;  %v3378_v7 = vld [vmem:[%s4447_s3] sm:$0xff]   ;;  %v3382_v12 = vld [vmem:[%s4447_s3 + $0x8] sm:$0xff]  }
  0x31   : > { %v2954_v35 = vcombine.low %v328_v20, %v336_v21  ;;  %v3379_v9 = vld [vmem:[%s4447_s3 + $0x80] sm:$0xff]   ;;  %v3383_v13 = vld [vmem:[%s4447_s3 + $0x88] sm:$0xff]   ;;  %v3391_v20 = vld [vmem:[%s4447_s3 + $0x98] sm:$0xff]  }
  0x32   : > { %v3392_v21 = vld [vmem:[%s4447_s3 + $0x60] sm:$0xff]  }
  0x33   : > { %1076 = vmatpush1.bf16.msra.mxu0 %v3008_v29  ;;  %1117 = vmatpush1.bf16.msra.mxu1 %v3010_v32  ;;  %v352_v29 = vld [vmem:[%s4445_s1 + $0xf8] sm:$0xff]  ;;  %v359_v32 = vld [vmem:[%s4445_s1 + $0x130] sm:$0xff] }
  0x34   : > { %1077 = vmatprep.subr.bf16.mxu0 %v3025_v31  ;;  %1118 = vmatprep.subr.bf16.mxu1 %v3027_v34  ;;  %v2952_v31 = vcombine.low %v327_v16, %v335_v17  ;;  %v2969_v34 = vcombine.high %v343_v24, %v351_v25  ;;  %v2971_v38 = vcombine.high %v344_v28, %v352_v29  ;;  %v3386_v16 = vld [vmem:[%s4447_s3 + $0x10] sm:$0xff]  }
  0x35   : > { %v2970_v43 = vcombine.low %v344_v28, %v352_v29  ;;  %v3387_v17 = vld [vmem:[%s4447_s3 + $0x90] sm:$0xff]   ;;  %v3399_v28 = vld [vmem:[%s4447_s3 + $0xa8] sm:$0xff]  }
  0x36   : > { %v3400_v29 = vld [vmem:[%s4447_s3 + $0x70] sm:$0xff]  }
  0x37   : > { %1078 = vmatpush1.bf16.msra.mxu0 %v3024_v37  ;;  %1119 = vmatpush1.bf16.msra.mxu1 %v3026_v39  ;;  %v368_v37 = vld [vmem:[%s4445_s1 + $0x178] sm:$0xff]  ;;  %v2968_v39 = vcombine.low %v343_v24, %v351_v25  ;;  %v3395_v24 = vld [vmem:[%s4447_s3 + $0xa0] sm:$0xff]   ;;  %v3396_v25 = vld [vmem:[%s4447_s3 + $0x68] sm:$0xff]  }
  0x38   : > { %1149 = vmatprep.subr.bf16.mxu0 %v2949_v40  ;;  %1190 = vmatprep.subr.bf16.mxu1 %v2951_v42  ;;  %v375_v40 = vld [vmem:[%s4445_s1 + $0x1b0] sm:$0xff]  ;;  %v2985_v42 = vcombine.high %v359_v32, %v367_v33  ;;  %v2987_v46 = vcombine.high %v360_v36, %v368_v37  ;;  %v2986_v51 = vcombine.low %v360_v36, %v368_v37  ;;  %v3407_v36 = vld [vmem:[%s4447_s3 + $0xb8] sm:$0xff]   ;;  %v3408_v37 = vld [vmem:[%s4447_s3 + $0x140] sm:$0xff]  }
  0x39   : > { %v3000_v54 = vcombine.low %v375_v40, %v383_v41 }
  0x3a   : > { %3038 = vmatmul.mubr.msk.bf16.vlgmr.msra.gmra.mrb[4].mxu0 %vm981_vm0, %v3696_v59  ;;  %3039 = vmatmul.mubr.msk.bf16.vlgmr.msra.gmra.mrb[4].mxu1 %vm981_vm0, %v3696_v59 }
  0x3b   : > { %1150 = vmatpush1.bf16.msra.mxu0 %v2948_v45  ;;  %1191 = vmatpush1.bf16.msra.mxu1 %v2950_v48  ;;  %v384_v45 = vld [vmem:[%s4445_s1 + $0x1f8] sm:$0xff]  ;;  %v391_v48 = vld [vmem:[%s4445_s1 + $0x230] sm:$0xff] }
  0x3c   : > { %1151 = vmatprep.subr.bf16.mxu0 %v2965_v47  ;;  %1192 = vmatprep.subr.bf16.mxu1 %v2967_v50  ;;  %v2984_v47 = vcombine.low %v359_v32, %v367_v33  ;;  %v3001_v50 = vcombine.high %v375_v40, %v383_v41  ;;  %v3017_v57 = vcombine.high %v391_v48, %v399_v49  ;;  %v3403_v32 = vld [vmem:[%s4447_s3 + $0xb0] sm:$0xff]   ;;  %v3404_v33 = vld [vmem:[%s4447_s3 + $0x78] sm:$0xff]  }
  0x3d   : > { %1181 = vmatprep.mubr.bf16.mxu0 %v3534_v8  ;;  %1222 = vmatprep.mubr.bf16.mxu1 %v3534_v8  ;;  %v3016_v63 = vcombine.low %v391_v48, %v399_v49 }
  0x3f   : > { %1152 = vmatpush1.bf16.msra.mxu0 %v2964_v53  ;;  %1193 = vmatpush1.bf16.msra.mxu1 %v2966_v56  ;;  %v3003_v53 = vcombine.high %v376_v44, %v384_v45  ;;  %v415_v56 = vld [vmem:[%s4445_s1 + $0x2f0] sm:$0xff] }
  0x40   : > { %1153 = vmatprep.subr.bf16.mxu0 %v2981_v55  ;;  %1194 = vmatprep.subr.bf16.mxu1 %v2983_v58  ;;  %v407_v55 = vld [vmem:[%s4445_s1 + $0x2b0] sm:$0xff]  ;;  %v3002_v58 = vcombine.low %v376_v44, %v384_v45 }
  0x41   : > { %v3033_v0 = vcombine.high %v407_v55, %v415_v56  ;;  %v3032_v4 = vcombine.low %v407_v55, %v415_v56 }
  0x43   : > { %1154 = vmatpush1.bf16.msra.mxu0 %v2980_v62  ;;  %1195 = vmatpush1.bf16.msra.mxu1 %v2982_v2  ;;  %v3035_v2 = vcombine.high %v408_v60, %v416_v61 }
  0x44   : > { %1155 = vmatprep.subr.bf16.mxu0 %v2997_v1  ;;  %1196 = vmatprep.subr.bf16.mxu1 %v2999_v5  ;;  %v3377_v5 = vld [vmem:[%s4447_s3 + $0xc0] sm:$0xff]  }
  0x47   : > { %1156 = vmatpush1.bf16.msra.mxu0 %v2996_v6  ;;  %1197 = vmatpush1.bf16.msra.mxu1 %v2998_v11  ;;  %v3034_v6 = vcombine.low %v408_v60, %v416_v61  ;;  %v3381_v11 = vld [vmem:[%s4447_s3 + $0xc8] sm:$0xff]  }
  0x48   : > { %1157 = vmatprep.subr.bf16.mxu0 %v3013_v10  ;;  %1198 = vmatprep.subr.bf16.mxu1 %v3015_v14  ;;  %v3380_v10 = vld [vmem:[%s4447_s3 + $0x48] sm:$0xff]   ;;  %v3384_v14 = vld [vmem:[%s4447_s3 + $0x50] sm:$0xff]  }
  0x4b   : > { %1158 = vmatpush1.bf16.msra.mxu0 %v3012_v15  ;;  %1199 = vmatpush1.bf16.msra.mxu1 %v3014_v19  ;;  %v3385_v15 = vld [vmem:[%s4447_s3 + $0xd0] sm:$0xff]   ;;  %v3390_v19 = vld [vmem:[%s4447_s3 + $0x18] sm:$0xff]  }
  0x4c   : > { %1159 = vmatprep.subr.bf16.mxu0 %v3029_v18  ;;  %1200 = vmatprep.subr.bf16.mxu1 %v3031_v22  ;;  %v3389_v18 = vld [vmem:[%s4447_s3 + $0xd8] sm:$0xff]   ;;  %v3393_v22 = vld [vmem:[%s4447_s3 + $0xe0] sm:$0xff]  }
  0x4f   : > { %1160 = vmatpush1.bf16.msra.mxu0 %v3028_v23  ;;  %1201 = vmatpush1.bf16.msra.mxu1 %v3030_v26  ;;  %v3394_v23 = vld [vmem:[%s4447_s3 + $0x20] sm:$0xff]   ;;  %v3397_v26 = vld [vmem:[%s4447_s3 + $0xe8] sm:$0xff]  }
  0x50   : > { %1231 = vmatprep.subr.bf16.mxu0 %v2953_v27  ;;  %1272 = vmatprep.subr.bf16.mxu1 %v2955_v30  ;;  %v3398_v27 = vld [vmem:[%s4447_s3 + $0x28] sm:$0xff]   ;;  %v3401_v30 = vld [vmem:[%s4447_s3 + $0xf0] sm:$0xff]  }
  0x52   : > { %3040 = vmatmul.mubr.msk.bf16.vlgmr.msra.gmra.mrb[8].mxu0 %vm981_vm0, %v3696_v59  ;;  %3041 = vmatmul.mubr.msk.bf16.vlgmr.msra.gmra.mrb[8].mxu1 %vm981_vm0, %v3696_v59 }
  0x53   : > { %1232 = vmatpush1.bf16.msra.mxu0 %v2952_v31  ;;  %1273 = vmatpush1.bf16.msra.mxu1 %v2954_v35  ;;  %v3402_v31 = vld [vmem:[%s4447_s3 + $0x30] sm:$0xff]   ;;  %v3406_v35 = vld [vmem:[%s4447_s3 + $0x38] sm:$0xff]  }
  0x54   : > { %1233 = vmatprep.subr.bf16.mxu0 %v2969_v34  ;;  %1274 = vmatprep.subr.bf16.mxu1 %v2971_v38  ;;  %v3405_v34 = vld [vmem:[%s4447_s3 + $0xf8] sm:$0xff]   ;;  %v3409_v38 = vld [vmem:[%s4447_s3 + $0x1c0] sm:$0xff]  }
  0x55   : > { %1263 = vmatprep.mubr.bf16.mxu0 %v3534_v8  ;;  %1304 = vmatprep.mubr.bf16.mxu1 %v3534_v8  ;;  %v400_v8 = vld [vmem:[%s4445_s1 + $0x278] sm:$0xff] }
  0x56   : > { %v3019_v62 = vcombine.high %v392_v52, %v400_v8  ;;  %v3018_v1 = vcombine.low %v392_v52, %v400_v8 }
  0x57   : > { %1234 = vmatpush1.bf16.msra.mxu0 %v2968_v39  ;;  %1275 = vmatpush1.bf16.msra.mxu1 %v2970_v43  ;;  %v421_v39 = vlaneseq }
  0x58   : > { %1235 = vmatprep.subr.bf16.mxu0 %v2985_v42  ;;  %1276 = vmatprep.subr.bf16.mxu1 %v2987_v46  ;;  %v4021_v42 = vld [vmem:[%s4446_s2] sm:$0xff] }
  0x59   : > { %v4015_v40 = vshrl.u32 %v421_v39, 7 }
  0x5b   : > { %1236 = vmatpush1.bf16.msra.mxu0 %v2984_v47  ;;  %1277 = vmatpush1.bf16.msra.mxu1 %v2986_v51  ;;  %v423_v41 = vsub.s32 0, %v4015_v40  ;;  %v431_v43 = vsub.s32 2, %v4015_v40  ;;  %v427_v44 = vsub.s32 1, %v4015_v40  ;;  %v435_v45 = vsub.s32 3, %v4015_v40 }
  0x5c   : > { %1237 = vmatprep.subr.bf16.mxu0 %v3001_v50  ;;  %1278 = vmatprep.subr.bf16.mxu1 %v3003_v53 }
  0x5d   : > { %v424_v46 = vrot.slane %v4021_v42, %v423_v41  ;;  %v432_v47 = vrot.slane %v4021_v42, %v431_v43  ;;  %v428_v48 = vrot.slane %v4021_v42, %v427_v44  ;;  %v436_v49 = vrot.slane %v4021_v42, %v435_v45 }
  0x5f   : > { %1238 = vmatpush1.bf16.msra.mxu0 %v3000_v54  ;;  %1279 = vmatpush1.bf16.msra.mxu1 %v3002_v58 }
  0x60   : > { %1239 = vmatprep.subr.bf16.mxu0 %v3017_v57  ;;  %1280 = vmatprep.subr.bf16.mxu1 %v3019_v62 }
  0x63   : > { %1240 = vmatpush1.bf16.msra.mxu0 %v3016_v63  ;;  %1281 = vmatpush1.bf16.msra.mxu1 %v3018_v1 }
  0x64   : > { %1241 = vmatprep.subr.bf16.mxu0 %v3033_v0  ;;  %1282 = vmatprep.subr.bf16.mxu1 %v3035_v2 }
  0x67   : > { %1242 = vmatpush1.bf16.msra.mxu0 %v3032_v4  ;;  %1283 = vmatpush1.bf16.msra.mxu1 %v3034_v6 }
  0x68   : > { %3175 = vmatprep.subr.bf16.mxu0 %v3376_v3  ;;  %3197 = vmatprep.subr.bf16.mxu1 %v3377_v5 }
  0x6a   : > { %3042 = vmatmul.mubr.msk.bf16.vlgmr.msra.gmra.mrb[12].mxu0 %vm981_vm0, %v3696_v59  ;;  %3043 = vmatmul.mubr.msk.bf16.vlgmr.msra.gmra.mrb[12].mxu1 %vm981_vm0, %v3696_v59  ;;  %v3388_v59 = vld [vmem:[%s4447_s3 + $0x58] sm:$0xff]  }
  0x6b   : > { %3176 = vmatpush3.bf16.msra.mxu0 %v3378_v7  ;;  %3198 = vmatpush3.bf16.msra.mxu1 %v3379_v9  ;;  %v3410_v7 = vld [vmem:[%s4447_s3 + $0x100] sm:$0xff]  }
  0x6c   : > { %3177 = vmatprep.subr.bf16.mxu0 %v3380_v10  ;;  %3199 = vmatprep.subr.bf16.mxu1 %v3381_v11  ;;  %v3411_v11 = vld [vmem:[%s4447_s3 + $0x180] sm:$0xff]  }
  0x6f   : > { %3178 = vmatpush3.bf16.msra.mxu0 %v3382_v12  ;;  %3200 = vmatpush3.bf16.msra.mxu1 %v3383_v13  ;;  %v3412_v12 = vld [vmem:[%s4447_s3 + $0x148] sm:$0xff]  }
  0x70   : > { %3179 = vmatprep.subr.bf16.mxu0 %v3384_v14  ;;  %3201 = vmatprep.subr.bf16.mxu1 %v3385_v15  ;;  %v3413_v14 = vld [vmem:[%s4447_s3 + $0x1c8] sm:$0xff]  }
  0x73   : > { %3180 = vmatpush3.bf16.msra.mxu0 %v3386_v16  ;;  %3202 = vmatpush3.bf16.msra.mxu1 %v3387_v17  ;;  %v3414_v17 = vld [vmem:[%s4447_s3 + $0x108] sm:$0xff]  }
  0x74   : > { %3181 = vmatprep.subr.bf16.mxu0 %v3388_v59  ;;  %3203 = vmatprep.subr.bf16.mxu1 %v3389_v18  ;;  %v3415_v59 = vld [vmem:[%s4447_s3 + $0x188] sm:$0xff]   ;;  %v3416_v18 = vld [vmem:[%s4447_s3 + $0x150] sm:$0xff]  }
  0x77   : > { %3182 = vmatpush3.bf16.msra.mxu0 %v3390_v19  ;;  %3204 = vmatpush3.bf16.msra.mxu1 %v3391_v20  ;;  %v3417_v20 = vld [vmem:[%s4447_s3 + $0x1d0] sm:$0xff]  }
  0x78   : > { %3183 = vmatprep.subr.bf16.mxu0 %v3392_v21  ;;  %3205 = vmatprep.subr.bf16.mxu1 %v3393_v22  ;;  %v3418_v21 = vld [vmem:[%s4447_s3 + $0x110] sm:$0xff]  }
  0x79   : > { %v3419_v22 = vld [vmem:[%s4447_s3 + $0x190] sm:$0xff]  }
  0x7b   : > { %3184 = vmatpush3.bf16.msra.mxu0 %v3394_v23  ;;  %3206 = vmatpush3.bf16.msra.mxu1 %v3395_v24  ;;  %v3420_v23 = vld [vmem:[%s4447_s3 + $0x158] sm:$0xff]  }
  0x7c   : > { %3185 = vmatprep.subr.bf16.mxu0 %v3396_v25  ;;  %3207 = vmatprep.subr.bf16.mxu1 %v3397_v26  ;;  %v3421_v24 = vld [vmem:[%s4447_s3 + $0x1d8] sm:$0xff]   ;;  %v439_v25 = vsub.s32 4, %v4015_v40 }
  0x7d   : > { %v3422_v26 = vld [vmem:[%s4447_s3 + $0x118] sm:$0xff]  }
  0x7f   : > { %3186 = vmatpush3.bf16.msra.mxu0 %v3398_v27  ;;  %3208 = vmatpush3.bf16.msra.mxu1 %v3399_v28  ;;  %v443_v27 = vsub.s32 5, %v4015_v40  ;;  %v447_v28 = vsub.s32 6, %v4015_v40 }
  0x80   : > { %3187 = vmatprep.subr.bf16.mxu0 %v3400_v29  ;;  %3209 = vmatprep.subr.bf16.mxu1 %v3401_v30  ;;  %v3423_v29 = vld [vmem:[%s4447_s3 + $0x198] sm:$0xff]   ;;  %v3424_v30 = vld [vmem:[%s4447_s3 + $0x160] sm:$0xff]  }
  0x83   : > { %3188 = vmatpush3.bf16.msra.mxu0 %v3402_v31  ;;  %3210 = vmatpush3.bf16.msra.mxu1 %v3403_v32  ;;  %v451_v31 = vsub.s32 7, %v4015_v40  ;;  %v3425_v32 = vld [vmem:[%s4447_s3 + $0x1e0] sm:$0xff]   ;;  %v3478_v40 = vld [vmem:[%s4447_s3 + $0x308] sm:$0xff]  }
  0x84   : > { %3189 = vmatprep.subr.bf16.mxu0 %v3404_v33  ;;  %3211 = vmatprep.subr.bf16.mxu1 %v3405_v34  ;;  %v440_v33 = vrot.slane %v4021_v42, %v439_v25  ;;  %v3426_v34 = vld [vmem:[%s4447_s3 + $0x120] sm:$0xff]  }
  0x87   : > { %3190 = vmatpush3.bf16.msra.mxu0 %v3406_v35  ;;  %3212 = vmatpush3.bf16.msra.mxu1 %v3407_v36  ;;  %v444_v35 = vrot.slane %v4021_v42, %v443_v27  ;;  %v448_v36 = vrot.slane %v4021_v42, %v447_v28 }
  0x88   : > { %3219 = vmatprep.subr.bf16.mxu0 %v3408_v37  ;;  %3241 = vmatprep.subr.bf16.mxu1 %v3409_v38  ;;  %v3427_v37 = vld [vmem:[%s4447_s3 + $0x1a0] sm:$0xff]   ;;  %v3428_v38 = vld [vmem:[%s4447_s3 + $0x168] sm:$0xff]  }
  0xf5   : > { %v1019_v50 = vpop.f32.mrb[0].mxu0  ;;  %v1060_v52 = vpop.f32.mrb[0].mxu1 }
  0xf6   : > { %v1020_v51 = vadd.f32 %v1019_v50, %v424_v46  ;;  %v1021_v8 = vpop.f32.mrb[1].mxu0  ;;  %v1061_v53 = vadd.f32 %v1060_v52, %v432_v47  ;;  %v1062_v55 = vpop.f32.mrb[1].mxu1  ;;  %v452_v46 = vrot.slane %v4021_v42, %v451_v31 }
  0xf7   : > { %v1022_v54 = vadd.f32 %v1021_v8, %v428_v48  ;;  %v1023_v56 = vpop.f32.mrb[2].mxu0  ;;  %v1063_v58 = vadd.f32 %v1062_v55, %v436_v49  ;;  %v1064_v60 = vpop.f32.mrb[2].mxu1  ;;  %v3429_v48 = vld [vmem:[%s4447_s3 + $0x1e8] sm:$0xff]  }
  0xf8   : > { %v1313_v57 = vmax.f32 %v1020_v51, 0.0  ;;  %v1024_v61 = vpop.f32.mrb[3].mxu0  ;;  %v1315_v62 = vmax.f32 %v1061_v53, 0.0  ;;  %v1065_v0 = vpop.f32.mrb[3].mxu1  ;;  %v3430_v53 = vld [vmem:[%s4447_s3 + $0x128] sm:$0xff]   ;;  %v3432_v60 = vld [vmem:[%s4447_s3 + $0x170] sm:$0xff]  }
  0xf9   : > { %v1314_v63 = vmax.f32 %v1022_v54, 0.0  ;;  %v1316_v2 = vmax.f32 %v1063_v58, 0.0  ;;  %v3431_v56 = vld [vmem:[%s4447_s3 + $0x1a8] sm:$0xff]   ;;  %v3433_v0 = vld [vmem:[%s4447_s3 + $0x1f0] sm:$0xff]  }
  0xfa   : > { %1329 = vst [vmem:[%s4042_s10] sm:$0xff] %v1313_v57  ;;  %v2705_v1 = vmul.f32 %v1313_v57, %v1313_v57  ;;  %1331 = vst [vmem:[%s4042_s10 + $0x10] sm:$0xff] %v1315_v62  ;;  %v1347_v3 = vpack.c.bf16 %v1315_v62, %v1315_v62  ;;  %v2707_v4 = vmul.f32 %v1315_v62, %v1315_v62 }
  0xfb   : > { %1330 = vst [vmem:[%s4042_s10 + $0x8] sm:$0xff] %v1314_v63  ;;  %v2706_v5 = vmul.f32 %v1314_v63, %v1314_v63  ;;  %v1346_v6 = vpack.c.bf16 %v1314_v63, %v1314_v63  ;;  %v1345_v9 = vpack.c.bf16 %v1313_v57, %v1313_v57  ;;  %1332 = vst [vmem:[%s4042_s10 + $0x18] sm:$0xff] %v1316_v2 }
  0xfc   : > { %v1348_v10 = vpack.c.bf16 %v1316_v2, %v1316_v2  ;;  %v2708_v15 = vmul.f32 %v1316_v2, %v1316_v2 }
  0xfd   : > { %v2721_v13 = vadd.f32 %v2706_v5, %v2705_v1  ;;  %2417 = vmatprep.mubr.bf16.mxu0 %v1346_v6  ;;  %v3434_v5 = vld [vmem:[%s4447_s3 + $0x130] sm:$0xff]  }
  0xfe   : > { %2457 = vmatprep.mubr.bf16.mxu1 %v1348_v10  ;;  %2418 = vmatmul.mubr.bf16.vlgmr.msra.gmra.mrb[16].mxu0 %v1345_v9  ;;  %v3435_v10 = vld [vmem:[%s4447_s3 + $0x1b0] sm:$0xff]  }
  0xff   : > { %v2722_v16 = vadd.f32 %v2721_v13, %v2707_v4  ;;  %2458 = vmatmul.mubr.bf16.vlgmr.msra.gmra.mrb[16].mxu1 %v1347_v3  ;;  %3220 = vmatpush3.bf16.msra.mxu0 %v3410_v7  ;;  %v3437_v13 = vld [vmem:[%s4447_s3 + $0x1f8] sm:$0xff]  }
 0x100   : > { %3242 = vmatpush3.bf16.msra.mxu1 %v3411_v11  ;;  %3221 = vmatprep.subr.bf16.mxu0 %v3412_v12  ;;  %v3436_v11 = vld [vmem:[%s4447_s3 + $0x178] sm:$0xff]  }
 0x101   : > { %v4069_v19 = vadd.f32 %v2722_v16, %v2708_v15  ;;  %3243 = vmatprep.subr.bf16.mxu1 %v3413_v14  ;;  %v3438_v16 = vld [vmem:[%s4447_s3 + $0x138] sm:$0xff]  }
 0x103   : > { %3222 = vmatpush3.bf16.msra.mxu0 %v3414_v17 }
 0x104   : > { %3244 = vmatpush3.bf16.msra.mxu1 %v3415_v59  ;;  %3223 = vmatprep.subr.bf16.mxu0 %v3416_v18  ;;  %v3439_v59 = vld [vmem:[%s4447_s3 + $0x1b8] sm:$0xff]   ;;  %v3440_v18 = vld [vmem:[%s4447_s3 + $0x240] sm:$0xff]  }
 0x105   : > { %3245 = vmatprep.subr.bf16.mxu1 %v3417_v20 }
 0x107   : > { %3224 = vmatpush3.bf16.msra.mxu0 %v3418_v21 }
 0x108   : > { %3246 = vmatpush3.bf16.msra.mxu1 %v3419_v22  ;;  %3225 = vmatprep.subr.bf16.mxu0 %v3420_v23  ;;  %v3442_v23 = vld [vmem:[%s4447_s3 + $0x200] sm:$0xff]  }
 0x109   : > { %3247 = vmatprep.subr.bf16.mxu1 %v3421_v24  ;;  %v3443_v24 = vld [vmem:[%s4447_s3 + $0x280] sm:$0xff]  }
 0x10b   : > { %3226 = vmatpush3.bf16.msra.mxu0 %v3422_v26  ;;  %v3444_v26 = vld [vmem:[%s4447_s3 + $0x248] sm:$0xff]  }
 0x10c   : > { %3248 = vmatpush3.bf16.msra.mxu1 %v3423_v29  ;;  %3227 = vmatprep.subr.bf16.mxu0 %v3424_v30  ;;  %v3445_v29 = vld [vmem:[%s4447_s3 + $0x2c8] sm:$0xff]  }
 0x10d   : > { %v1101_v47 = vpop.f32.mrb[4].mxu0  ;;  %3249 = vmatprep.subr.bf16.mxu1 %v3425_v32  ;;  %v1142_v51 = vpop.f32.mrb[4].mxu1  ;;  %v3446_v30 = vld [vmem:[%s4447_s3 + $0x208] sm:$0xff]  }
 0x10e   : > { %v1102_v49 = vadd.f32 %v1101_v47, %v440_v33  ;;  %v1103_v50 = vpop.f32.mrb[5].mxu0  ;;  %v1143_v8 = vadd.f32 %v1142_v51, %v448_v36  ;;  %v1144_v54 = vpop.f32.mrb[5].mxu1  ;;  %v4187_v32 = vld [vmem:[%s4446_s2 + $0x8] sm:$0xff]  ;;  %v3451_v47 = vld [vmem:[%s4447_s3 + $0x290] sm:$0xff]  }
 0x10f   : > { %3228 = vmatpush3.bf16.msra.mxu0 %v3426_v34  ;;  %v1104_v52 = vadd.f32 %v1103_v50, %v444_v35  ;;  %v1105_v55 = vpop.f32.mrb[6].mxu0  ;;  %v1145_v57 = vadd.f32 %v1144_v54, %v452_v46  ;;  %v1146_v61 = vpop.f32.mrb[6].mxu1  ;;  %v3447_v33 = vld [vmem:[%s4447_s3 + $0x288] sm:$0xff]   ;;  %v3448_v34 = vld [vmem:[%s4447_s3 + $0x250] sm:$0xff]   ;;  %v456_v36 = vrot.slane %v4187_v32, %v423_v41  ;;  %v464_v46 = vrot.slane %v4187_v32, %v431_v43  ;;  %v3452_v41 = vld [vmem:[%s4447_s3 + $0x258] sm:$0xff]  }
 0x110   : > { %v1317_v42 = vmax.f32 %v1102_v49, 0.0  ;;  %3250 = vmatpush3.bf16.msra.mxu1 %v3427_v37  ;;  %3229 = vmatprep.subr.bf16.mxu0 %v3428_v38  ;;  %v1106_v58 = vpop.f32.mrb[7].mxu0  ;;  %v1319_v63 = vmax.f32 %v1143_v8, 0.0  ;;  %v1147_v1 = vpop.f32.mrb[7].mxu1  ;;  %v3449_v35 = vld [vmem:[%s4447_s3 + $0x2d0] sm:$0xff]   ;;  %v460_v38 = vrot.slane %v4187_v32, %v427_v44  ;;  %v3453_v43 = vld [vmem:[%s4447_s3 + $0x2d8] sm:$0xff]  }
 0x111   : > { %v1318_v62 = vmax.f32 %v1104_v52, 0.0  ;;  %3251 = vmatprep.subr.bf16.mxu1 %v3429_v48  ;;  %v1320_v3 = vmax.f32 %v1145_v57, 0.0  ;;  %v3450_v37 = vld [vmem:[%s4447_s3 + $0x210] sm:$0xff]   ;;  %v468_v48 = vrot.slane %v4187_v32, %v435_v45  ;;  %v3456_v57 = vld [vmem:[%s4447_s3 + $0x260] sm:$0xff]  }
 0x112   : > { %1333 = vst [vmem:[%s4042_s10 + $0x20] sm:$0xff] %v1317_v42  ;;  %v2709_v2 = vmul.f32 %v1317_v42, %v1317_v42  ;;  %1335 = vst [vmem:[%s4042_s10 + $0x30] sm:$0xff] %v1319_v63  ;;  %v2711_v9 = vmul.f32 %v1319_v63, %v1319_v63  ;;  %v1349_v20 = vpack.c.bf16 %v1317_v42, %v1317_v42  ;;  %v3455_v42 = vld [vmem:[%s4447_s3 + $0x298] sm:$0xff]  }
 0x113   : > { %1334 = vst [vmem:[%s4042_s10 + $0x28] sm:$0xff] %v1318_v62  ;;  %v2710_v4 = vmul.f32 %v1318_v62, %v1318_v62  ;;  %3230 = vmatpush3.bf16.msra.mxu0 %v3430_v53  ;;  %v1350_v6 = vpack.c.bf16 %v1318_v62, %v1318_v62  ;;  %1336 = vst [vmem:[%s4042_s10 + $0x38] sm:$0xff] %v1320_v3  ;;  %v1352_v12 = vpack.c.bf16 %v1320_v3, %v1320_v3  ;;  %v3454_v53 = vld [vmem:[%s4447_s3 + $0x218] sm:$0xff]  }
 0x114   : > { %v2724_v7 = vadd.f32 %v4069_v19, %v2709_v2  ;;  %3252 = vmatpush3.bf16.msra.mxu1 %v3431_v56  ;;  %3231 = vmatprep.subr.bf16.mxu0 %v3432_v60  ;;  %v2712_v15 = vmul.f32 %v1320_v3, %v1320_v3  ;;  %v3441_v19 = vld [vmem:[%s4447_s3 + $0x2c0] sm:$0xff]   ;;  %v1351_v22 = vpack.c.bf16 %v1319_v63, %v1319_v63 }
 0x115   : > { %3253 = vmatprep.subr.bf16.mxu1 %v3433_v0  ;;  %2497 = vmatprep.mubr.bf16.mxu0 %v1350_v6  ;;  %v3457_v63 = vld [vmem:[%s4447_s3 + $0x2e0] sm:$0xff]  }
 0x116   : > { %v2725_v14 = vadd.f32 %v2724_v7, %v2710_v4  ;;  %2537 = vmatprep.mubr.bf16.mxu1 %v1352_v12  ;;  %v3458_v4 = vld [vmem:[%s4447_s3 + $0x220] sm:$0xff]   ;;  %v3461_v12 = vld [vmem:[%s4447_s3 + $0x2e8] sm:$0xff]  }
 0x117   : > { %3232 = vmatpush3.bf16.msra.mxu0 %v3434_v5 }
 0x118   : > { %v2726_v17 = vadd.f32 %v2725_v14, %v2711_v9  ;;  %3254 = vmatpush3.bf16.msra.mxu1 %v3435_v10  ;;  %3233 = vmatprep.subr.bf16.mxu0 %v3436_v11  ;;  %v3459_v9 = vld [vmem:[%s4447_s3 + $0x2a0] sm:$0xff]   ;;  %v3460_v10 = vld [vmem:[%s4447_s3 + $0x268] sm:$0xff]  }
 0x119   : > { %3255 = vmatprep.subr.bf16.mxu1 %v3437_v13 }
 0x11a   : > { %v4167_v21 = vadd.f32 %v2726_v17, %v2712_v15  ;;  %v3462_v15 = vld [vmem:[%s4447_s3 + $0x228] sm:$0xff]  }
 0x11b   : > { %3234 = vmatpush3.bf16.msra.mxu0 %v3438_v16  ;;  %v3463_v17 = vld [vmem:[%s4447_s3 + $0x2a8] sm:$0xff]  }
 0x11c   : > { %3256 = vmatpush3.bf16.msra.mxu1 %v3439_v59  ;;  %3263 = vmatprep.subr.bf16.mxu0 %v3440_v18  ;;  %v3464_v59 = vld [vmem:[%s4447_s3 + $0x270] sm:$0xff]  }
 0x11d   : > { %3285 = vmatprep.subr.bf16.mxu1 %v3441_v19  ;;  %v3465_v18 = vld [vmem:[%s4447_s3 + $0x2f0] sm:$0xff]  }
 0x11e   : > { %2498 = vmatmul.mubr.bf16.vlgmr.msra.gmra.mrb[20].mxu0 %v1349_v20  ;;  %v3466_v20 = vld [vmem:[%s4447_s3 + $0x230] sm:$0xff]  }
 0x11f   : > { %2538 = vmatmul.mubr.bf16.vlgmr.msra.gmra.mrb[20].mxu1 %v1351_v22  ;;  %3264 = vmatpush3.bf16.msra.mxu0 %v3442_v23  ;;  %v3468_v22 = vld [vmem:[%s4447_s3 + $0x278] sm:$0xff]  }
 0x120   : > { %3286 = vmatpush3.bf16.msra.mxu1 %v3443_v24  ;;  %3265 = vmatprep.subr.bf16.mxu0 %v3444_v26  ;;  %v3469_v23 = vld [vmem:[%s4447_s3 + $0x2f8] sm:$0xff]  }
 0x121   : > { %3287 = vmatprep.subr.bf16.mxu1 %v3445_v29  ;;  %v3470_v24 = vld [vmem:[%s4447_s3 + $0x238] sm:$0xff]   ;;  %v3472_v29 = vld [vmem:[%s4447_s3 + $0x340] sm:$0xff]  }
 0x122   : > { %v3471_v26 = vld [vmem:[%s4447_s3 + $0x2b8] sm:$0xff]  }
 0x123   : > { %3266 = vmatpush3.bf16.msra.mxu0 %v3446_v30  ;;  %v3473_v30 = vld [vmem:[%s4447_s3 + $0x3c0] sm:$0xff]  }
 0x124   : > { %3288 = vmatpush3.bf16.msra.mxu1 %v3447_v33  ;;  %3267 = vmatprep.subr.bf16.mxu0 %v3448_v34  ;;  %v472_v34 = vrot.slane %v4187_v32, %v439_v25  ;;  %v3475_v25 = vld [vmem:[%s4447_s3 + $0x380] sm:$0xff]  }
 0x125   : > { %v1183_v49 = vpop.f32.mrb[8].mxu0  ;;  %3289 = vmatprep.subr.bf16.mxu1 %v3449_v35  ;;  %v1224_v51 = vpop.f32.mrb[8].mxu1 }
 0x126   : > { %v1184_v44 = vadd.f32 %v1183_v49, %v456_v36  ;;  %v1185_v50 = vpop.f32.mrb[9].mxu0  ;;  %v1225_v8 = vadd.f32 %v1224_v51, %v464_v46  ;;  %v1226_v54 = vpop.f32.mrb[9].mxu1  ;;  %v3474_v36 = vld [vmem:[%s4447_s3 + $0x300] sm:$0xff]   ;;  %v3476_v46 = vld [vmem:[%s4447_s3 + $0x348] sm:$0xff]  }
 0x127   : > { %3268 = vmatpush3.bf16.msra.mxu0 %v3450_v37  ;;  %v1186_v52 = vadd.f32 %v1185_v50, %v460_v38  ;;  %v1187_v55 = vpop.f32.mrb[10].mxu0  ;;  %v1227_v56 = vadd.f32 %v1226_v54, %v468_v48  ;;  %v1228_v60 = vpop.f32.mrb[10].mxu1  ;;  %v476_v37 = vrot.slane %v4187_v32, %v443_v27  ;;  %v480_v38 = vrot.slane %v4187_v32, %v447_v28  ;;  %v3477_v27 = vld [vmem:[%s4447_s3 + $0x3c8] sm:$0xff]  }
 0x128   : > { %v4225_v45 = vmax.f32 %v1184_v44, 0.0  ;;  %3290 = vmatpush3.bf16.msra.mxu1 %v3451_v47  ;;  %3269 = vmatprep.subr.bf16.mxu0 %v3452_v41  ;;  %v1188_v58 = vpop.f32.mrb[11].mxu0  ;;  %v4233_v62 = vmax.f32 %v1225_v8, 0.0  ;;  %v1229_v0 = vpop.f32.mrb[11].mxu1  ;;  %v484_v47 = vrot.slane %v4187_v32, %v451_v31  ;;  %v3479_v51 = vld [vmem:[%s4447_s3 + $0x388] sm:$0xff]   ;;  %v3480_v8 = vld [vmem:[%s4447_s3 + $0x350] sm:$0xff]  }
 0x129   : > { %v1322_v61 = vmax.f32 %v1186_v52, 0.0  ;;  %3291 = vmatprep.subr.bf16.mxu1 %v3453_v43  ;;  %v1324_v2 = vmax.f32 %v1227_v56, 0.0  ;;  %v3484_v0 = vld [vmem:[%s4447_s3 + $0x358] sm:$0xff]  }
 0x12a   : > { %1337 = vst [vmem:[%s4042_s10 + $0x40] sm:$0xff] %v4225_v45  ;;  %v2713_v1 = vmul.f32 %v4225_v45, %v4225_v45  ;;  %1339 = vst [vmem:[%s4042_s10 + $0x50] sm:$0xff] %v4233_v62  ;;  %v2715_v7 = vmul.f32 %v4233_v62, %v4233_v62  ;;  %v1353_v33 = vpack.c.bf16 %v4225_v45, %v4225_v45 }
 0x12b   : > { %1338 = vst [vmem:[%s4042_s10 + $0x48] sm:$0xff] %v1322_v61  ;;  %v2714_v3 = vmul.f32 %v1322_v61, %v1322_v61  ;;  %3270 = vmatpush3.bf16.msra.mxu0 %v3454_v53  ;;  %v1354_v5 = vpack.c.bf16 %v1322_v61, %v1322_v61  ;;  %1340 = vst [vmem:[%s4042_s10 + $0x58] sm:$0xff] %v1324_v2  ;;  %v1356_v11 = vpack.c.bf16 %v1324_v2, %v1324_v2  ;;  %v3482_v61 = vld [vmem:[%s4447_s3 + $0x310] sm:$0xff]  }
 0x12c   : > { %v2728_v6 = vadd.f32 %v4167_v21, %v2713_v1  ;;  %3292 = vmatpush3.bf16.msra.mxu1 %v3455_v42  ;;  %3271 = vmatprep.subr.bf16.mxu0 %v3456_v57  ;;  %v2716_v14 = vmul.f32 %v1324_v2, %v1324_v2  ;;  %v3467_v21 = vld [vmem:[%s4447_s3 + $0x2b0] sm:$0xff]   ;;  %v1355_v35 = vpack.c.bf16 %v4233_v62, %v4233_v62 }
 0x12d   : > { %3293 = vmatprep.subr.bf16.mxu1 %v3457_v63  ;;  %2577 = vmatprep.mubr.bf16.mxu0 %v1354_v5  ;;  %v3481_v42 = vld [vmem:[%s4447_s3 + $0x3d0] sm:$0xff]  }
 0x12e   : > { %v2729_v13 = vadd.f32 %v2728_v6, %v2714_v3  ;;  %2617 = vmatprep.mubr.bf16.mxu1 %v1356_v11  ;;  %v3483_v63 = vld [vmem:[%s4447_s3 + $0x390] sm:$0xff]  }
 0x12f   : > { %3272 = vmatpush3.bf16.msra.mxu0 %v3458_v4  ;;  %v3485_v4 = vld [vmem:[%s4447_s3 + $0x3d8] sm:$0xff]  }
 0x130   : > { %v2730_v16 = vadd.f32 %v2729_v13, %v2715_v7  ;;  %3294 = vmatpush3.bf16.msra.mxu1 %v3459_v9  ;;  %3273 = vmatprep.subr.bf16.mxu0 %v3460_v10  ;;  %v3486_v7 = vld [vmem:[%s4447_s3 + $0x318] sm:$0xff]   ;;  %v3488_v10 = vld [vmem:[%s4447_s3 + $0x360] sm:$0xff]  }
 0x131   : > { %3295 = vmatprep.subr.bf16.mxu1 %v3461_v12  ;;  %v3487_v9 = vld [vmem:[%s4447_s3 + $0x398] sm:$0xff]   ;;  %v3489_v12 = vld [vmem:[%s4447_s3 + $0x3e0] sm:$0xff]  }
 0x132   : > { %v4273_v19 = vadd.f32 %v2730_v16, %v2716_v14  ;;  %v3490_v14 = vld [vmem:[%s4447_s3 + $0x320] sm:$0xff]   ;;  %v3492_v16 = vld [vmem:[%s4447_s3 + $0x368] sm:$0xff]  }
 0x133   : > { %3274 = vmatpush3.bf16.msra.mxu0 %v3462_v15  ;;  %v3491_v15 = vld [vmem:[%s4447_s3 + $0x3a0] sm:$0xff]  }
 0x134   : > { %3296 = vmatpush3.bf16.msra.mxu1 %v3463_v17  ;;  %3275 = vmatprep.subr.bf16.mxu0 %v3464_v59  ;;  %v3493_v17 = vld [vmem:[%s4447_s3 + $0x3e8] sm:$0xff]  }
 0x135   : > { %3297 = vmatprep.subr.bf16.mxu1 %v3465_v18  ;;  %v3494_v59 = vld [vmem:[%s4447_s3 + $0x328] sm:$0xff]  }
 0x136   : > { %v3495_v18 = vld [vmem:[%s4447_s3 + $0x3a8] sm:$0xff]  }
 0x137   : > { %3276 = vmatpush3.bf16.msra.mxu0 %v3466_v20  ;;  %v3497_v20 = vld [vmem:[%s4447_s3 + $0x3f0] sm:$0xff]  }
 0x138   : > { %3298 = vmatpush3.bf16.msra.mxu1 %v3467_v21  ;;  %3277 = vmatprep.subr.bf16.mxu0 %v3468_v22  ;;  %v3498_v21 = vld [vmem:[%s4447_s3 + $0x330] sm:$0xff]  }
 0x139   : > { %3299 = vmatprep.subr.bf16.mxu1 %v3469_v23  ;;  %v3499_v22 = vld [vmem:[%s4447_s3 + $0x3b0] sm:$0xff]   ;;  %v3500_v23 = vld [vmem:[%s4447_s3 + $0x378] sm:$0xff]  }
 0x13b   : > { %3278 = vmatpush3.bf16.msra.mxu0 %v3470_v24  ;;  %v3501_v24 = vld [vmem:[%s4447_s3 + $0x3f8] sm:$0xff]  }
 0x13c   : > { %3300 = vmatpush3.bf16.msra.mxu1 %v3471_v26  ;;  %3307 = vmatprep.subr.bf16.mxu0 %v3472_v29  ;;  %v3502_v26 = vld [vmem:[%s4447_s3 + $0x338] sm:$0xff]  }
 0x13d   : > { %v1265_v41 = vpop.f32.mrb[12].mxu0  ;;  %3329 = vmatprep.subr.bf16.mxu1 %v3473_v30  ;;  %v1306_v49 = vpop.f32.mrb[12].mxu1  ;;  %v3503_v29 = vld [vmem:[%s4447_s3 + $0x3b8] sm:$0xff]  }
 0x13e   : > { %v1266_v28 = vadd.f32 %v1265_v41, %v472_v34  ;;  %2578 = vmatmul.mubr.bf16.vlgmr.msra.gmra.mrb[24].mxu0 %v1353_v33  ;;  %v1267_v48 = vpop.f32.mrb[13].mxu0  ;;  %v1307_v44 = vadd.f32 %v1306_v49, %v480_v38  ;;  %v1308_v31 = vpop.f32.mrb[13].mxu1 }
 0x13f   : > { %2618 = vmatmul.mubr.bf16.vlgmr.msra.gmra.mrb[24].mxu1 %v1355_v35  ;;  %3308 = vmatpush3.bf16.msra.mxu0 %v3474_v36  ;;  %v1268_v43 = vadd.f32 %v1267_v48, %v476_v37  ;;  %v1269_v32 = vpop.f32.mrb[14].mxu0  ;;  %v1309_v52 = vadd.f32 %v1308_v31, %v484_v47  ;;  %v1310_v54 = vpop.f32.mrb[14].mxu1 }
 0x140   : > { %v4330_v50 = vmax.f32 %v1266_v28, 0.0  ;;  %3330 = vmatpush3.bf16.msra.mxu1 %v3475_v25  ;;  %3309 = vmatprep.subr.bf16.mxu0 %v3476_v46  ;;  %v1270_v53 = vpop.f32.mrb[15].mxu0  ;;  %v4338_v45 = vmax.f32 %v1307_v44, 0.0  ;;  %v1311_v56 = vpop.f32.mrb[15].mxu1 }
 0x141   : > { %v1326_v55 = vmax.f32 %v1268_v43, 0.0  ;;  %3331 = vmatprep.subr.bf16.mxu1 %v3477_v27  ;;  %v1328_v58 = vmax.f32 %v1309_v52, 0.0 }
 0x142   : > { %1341 = vst [vmem:[%s4042_s10 + $0x60] sm:$0xff] %v4330_v50  ;;  %v2717_v57 = vmul.f32 %v4330_v50, %v4330_v50  ;;  %1343 = vst [vmem:[%s4042_s10 + $0x70] sm:$0xff] %v4338_v45  ;;  %v2719_v2 = vmul.f32 %v4338_v45, %v4338_v45  ;;  %v1359_v30 = vpack.c.bf16 %v4338_v45, %v4338_v45 }
 0x143   : > { %1342 = vst [vmem:[%s4042_s10 + $0x68] sm:$0xff] %v1326_v55  ;;  %v2718_v60 = vmul.f32 %v1326_v55, %v1326_v55  ;;  %3310 = vmatpush3.bf16.msra.mxu0 %v3478_v40  ;;  %v1358_v62 = vpack.c.bf16 %v1326_v55, %v1326_v55  ;;  %1344 = vst [vmem:[%s4042_s10 + $0x78] sm:$0xff] %v1328_v58  ;;  %v1360_v1 = vpack.c.bf16 %v1328_v58, %v1328_v58 }
 0x144   : > { %3332 = vmatpush3.bf16.msra.mxu1 %v3479_v51  ;;  %3311 = vmatprep.subr.bf16.mxu0 %v3480_v8  ;;  %v2732_v3 = vadd.f32 %v4273_v19, %v2717_v57  ;;  %v2720_v5 = vmul.f32 %v1328_v58, %v1328_v58  ;;  %v3496_v19 = vld [vmem:[%s4447_s3 + $0x370] sm:$0xff]   ;;  %v1357_v33 = vpack.c.bf16 %v4330_v50, %v4330_v50 }
 0x145   : > { %3333 = vmatprep.subr.bf16.mxu1 %v3481_v42  ;;  %2657 = vmatprep.mubr.bf16.mxu0 %v1358_v62 }
 0x146   : > { %2697 = vmatprep.mubr.bf16.mxu1 %v1360_v1  ;;  %v2733_v6 = vadd.f32 %v2732_v3, %v2718_v60 }
 0x147   : > { %3312 = vmatpush3.bf16.msra.mxu0 %v3482_v61 }
 0x148   : > { %3334 = vmatpush3.bf16.msra.mxu1 %v3483_v63  ;;  %3313 = vmatprep.subr.bf16.mxu0 %v3484_v0  ;;  %v2734_v11 = vadd.f32 %v2733_v6, %v2719_v2 }
 0x149   : > { %3335 = vmatprep.subr.bf16.mxu1 %v3485_v4  ;;  %v2746_v4 = vand.u32 127, %v421_v39 }
 0x14a   : > { %v4378_v13 = vadd.f32 %v2734_v11, %v2720_v5 }
 0x14b   : > { %3314 = vmatpush3.bf16.msra.mxu0 %v3486_v7  ;;  %vm2750_vm1 = vcmp.lt.s32.totalorder %v2746_v4, 4  ;;  %vm2747_vm2 = vcmp.eq.s32.totalorder %v2746_v4, 4 }
 0x14c   : > { %3336 = vmatpush3.bf16.msra.mxu1 %v3487_v9  ;;  %3315 = vmatprep.subr.bf16.mxu0 %v3488_v10 }
 0x14d   : > { %3337 = vmatprep.subr.bf16.mxu1 %v3489_v12 }
 0x14f   : > { %3316 = vmatpush3.bf16.msra.mxu0 %v3490_v14 }
 0x150   : > { %3338 = vmatpush3.bf16.msra.mxu1 %v3491_v15  ;;  %3317 = vmatprep.subr.bf16.mxu0 %v3492_v16 }
 0x151   : > { %3339 = vmatprep.subr.bf16.mxu1 %v3493_v17 }
 0x153   : > { %3318 = vmatpush3.bf16.msra.mxu0 %v3494_v59 }
 0x154   : > { %3340 = vmatpush3.bf16.msra.mxu1 %v3495_v18  ;;  %3319 = vmatprep.subr.bf16.mxu0 %v3496_v19 }
 0x155   : > { %3341 = vmatprep.subr.bf16.mxu1 %v3497_v20 }
 0x157   : > { %3320 = vmatpush3.bf16.msra.mxu0 %v3498_v21 }
 0x158   : > { %3342 = vmatpush3.bf16.msra.mxu1 %v3499_v22  ;;  %3321 = vmatprep.subr.bf16.mxu0 %v3500_v23 }
 0x159   : > { %3343 = vmatprep.subr.bf16.mxu1 %v3501_v24 }
 0x15b   : > { %3322 = vmatpush3.bf16.msra.mxu0 %v3502_v26 }
 0x15c   : > { %3344 = vmatpush3.bf16.msra.mxu1 %v3503_v29 }
 0x15e   : > { %2658 = vmatmul.mubr.bf16.vlgmr.msra.gmra.mrb[28].mxu0 %v1357_v33 }
 0x15f   : > { %2698 = vmatmul.mubr.bf16.vlgmr.msra.gmra.mrb[28].mxu1 %v1359_v30 }
 0x1d1   : > { %v3191_v34 = vpop.f32.mrb[16].mxu0 }
 0x1d2   : > { %v3213_v35 = vpop.f32.mrb[16].mxu1  ;;  %v3192_v36 = vpop.f32.mrb[17].mxu0 }
 0x1d3   : > { %v3193_v37 = vadd.f32 %v3192_v36, %v3191_v34  ;;  %v3214_v38 = vpop.f32.mrb[17].mxu1  ;;  %v3194_v25 = vpop.f32.mrb[18].mxu0 }
 0x1d4   : > { %v3215_v46 = vadd.f32 %v3214_v38, %v3213_v35  ;;  %v3216_v47 = vpop.f32.mrb[18].mxu1  ;;  %v3195_v41 = vpop.f32.mrb[19].mxu0 }
 0x1d5   : > { %v3217_v27 = vpop.f32.mrb[19].mxu1 }
 0x1d6   : > { %v2460_v28 = vadd.f32 %v3215_v46, %v3193_v37 }
 0x1f1   : > { %v3235_v48 = vpop.f32.mrb[20].mxu0 }
 0x1f2   : > { %v3257_v49 = vpop.f32.mrb[20].mxu1  ;;  %v3236_v43 = vpop.f32.mrb[21].mxu0 }
 0x1f3   : > { %v3237_v44 = vadd.f32 %v3236_v43, %v3235_v48  ;;  %v3258_v40 = vpop.f32.mrb[21].mxu1  ;;  %v3238_v31 = vpop.f32.mrb[22].mxu0 }
 0x1f4   : > { %v3259_v32 = vadd.f32 %v3258_v40, %v3257_v49  ;;  %v3260_v50 = vpop.f32.mrb[22].mxu1  ;;  %v3239_v51 = vpop.f32.mrb[23].mxu0 }
 0x1f5   : > { %v2500_v52 = vadd.f32 %v3237_v44, %v2460_v28  ;;  %v3261_v8 = vpop.f32.mrb[23].mxu1 }
 0x1f7   : > { %v2540_v53 = vadd.f32 %v3259_v32, %v2500_v52 }
 0x211   : > { %v3279_v54 = vpop.f32.mrb[24].mxu0 }
 0x212   : > { %v3301_v55 = vpop.f32.mrb[24].mxu1  ;;  %v3280_v45 = vpop.f32.mrb[25].mxu0 }
 0x213   : > { %v3281_v42 = vadd.f32 %v3280_v45, %v3279_v54  ;;  %v3302_v56 = vpop.f32.mrb[25].mxu1  ;;  %v3282_v57 = vpop.f32.mrb[26].mxu0 }
 0x214   : > { %v3303_v58 = vadd.f32 %v3302_v56, %v3301_v55  ;;  %v3304_v60 = vpop.f32.mrb[26].mxu1  ;;  %v3283_v61 = vpop.f32.mrb[27].mxu0 }
 0x215   : > { %v2580_v62 = vadd.f32 %v3281_v42, %v2540_v53  ;;  %v3305_v63 = vpop.f32.mrb[27].mxu1 }
 0x217   : > { %v2620_v0 = vadd.f32 %v3303_v58, %v2580_v62 }
 0x231   : > { %v3323_v1 = vpop.f32.mrb[28].mxu0 }
 0x232   : > { %v3345_v2 = vpop.f32.mrb[28].mxu1  ;;  %v3324_v3 = vpop.f32.mrb[29].mxu0 }
 0x233   : > { %v3325_v5 = vadd.f32 %v3324_v3, %v3323_v1  ;;  %v3346_v6 = vpop.f32.mrb[29].mxu1  ;;  %v3326_v7 = vpop.f32.mrb[30].mxu0 }
 0x234   : > { %v3347_v9 = vadd.f32 %v3346_v6, %v3345_v2  ;;  %v3348_v10 = vpop.f32.mrb[30].mxu1  ;;  %v3327_v11 = vpop.f32.mrb[31].mxu0 }
 0x235   : > { %v2660_v12 = vadd.f32 %v3325_v5, %v2620_v0  ;;  %v3349_v14 = vpop.f32.mrb[31].mxu1 }
 0x237   : > { %v2700_v15 = vadd.f32 %v3347_v9, %v2660_v12 }
 0x239   : > { %v2751_v16 = vsel %vm2750_vm1, %v2700_v15, -1e+30 }
 0x23a   : > { %2752 = vmax.xlane.f32.xlu0 %v2751_v16 }
 0x23e   : > { %2736 = vadd.xlane.f32.xlu0 %v4378_v13 }
 0x2c7   : > { %v2753_v17 = vpop.xlane.xlu0 %2752 }
 0x2c8   : > { %v2754_v59 = vsub.f32 %v2751_v16, %v2753_v17 }
 0x2ca   : > { %v2755_v18 = vmul.f32 1.442695, %v2754_v59 }
 0x2cb   : > { %v2737_v19 = vpop.xlane.xlu0 %2736 }
 0x2cc   : > { %3504 = vpow2.f32 %v2755_v18  ;;  %vm2740_vm3 = vcmp.eq.f32.partialorder %v2737_v19, inf  ;;  %v2743_v22 = vand.u32 2147483648, %v2737_v19  ;;  %vm2742_vm4 = vcmp.eq.f32.partialorder %v2737_v19, 0.0 }
 0x2cd   : > { %3506 = vrsqrt.f32 %v2737_v19 }
 0x2d6   : > { %v3505_v39 = vpop.eup %3504 }
 0x2d7   : > { %v3507_v20 = vpop.eup %3506  ;;  %2757 = vadd.xlane.f32.xlu1 %v3505_v39 }
 0x2d8   : > { %v2739_v21 = vmul.f32 %v3507_v20, %v2737_v19 }
 0x2da   : > { %v2741_v23 = vsel %vm2740_vm3, %v2737_v19, %v2739_v21 }
 0x2db   : > { %v2744_v13 = vsel %vm2742_vm4, %v2743_v22, %v2741_v23 }
 0x2dc   : > { %v2748_v24 = vsel %vm2747_vm2, %v2744_v13, %v2700_v15 }
 0x2dd   : > { %2749 = vst [vmem:[%s311_s12] sm:$0xff] %v2748_v24 }
 0x364   : > { %v2758_v26 = vpop.xlane.xlu1 %2757 }
 0x365   : > { %3508 = vrcp.f32 %v2758_v26 }
 0x36f   : > { %v3509_v29 = vpop.eup %3508 }
 0x370   : > { %v2760_v30 = vmul.f32 %v3509_v29, %v3505_v39 }
 0x372   : > { %2761 = vst [vmem:[%s318_s21] sm:$0xff] %v2760_v30 }
 0x373 PF: > { %s17_s23 = sadd.s32 1, %s3532_s23   ;;  %s4451_s21 = smov %s3528_s22 }
 0x374   : > { %p14_p5 = scmp.ge.s32.totalorder %s17_s23, 4   ;;  %s4452_s22 = smov %s4454_s24 }
 0x376   :  { %16 = sbr.rel (!%p14_p5) target bundleno = 2 (0x2), region = 90 }

</bundles_post_ra>
